<compile_context>
chip_gen: v5e
topology: v5e:2x2
jax: 0.10.0
libtpu: 0.0.40
codegen_flags: <defaults>
</compile_context>

<pallas_src>
import functools

import jax
import jax.numpy as jnp
from jax.experimental import pallas as pl
from jax.experimental.pallas import tpu as pltpu


def _roll_lanes(x, k):
    """Cyclic shift along the last (lane) axis: result[..., p] = x[..., (p + k) % n]."""
    n = x.shape[-1]
    k = k % n
    if k == 0:
        return x
    return jnp.concatenate([x[..., k:], x[..., :k]], axis=-1)


def cbam_kernel(x_ref, w1_ref, w2_ref, wsp_ref, bsp_ref, out_ref, *, H, W, KS):
    # x_ref / out_ref: (Bb, C, H*W)  VMEM (lane-dense)
    # w1_ref: (C_r, C), w2_ref: (C, C_r)  VMEM  (SE 1x1-conv weights, no bias)
    # wsp_ref: (2, KS*KS) VMEM  (spatial conv weight, row = input channel)
    # bsp_ref: (1,)       SMEM  (spatial conv bias)
    Bb, C, HW = x_ref.shape
    PAD = KS // 2
    inv_hw = 1.0 / float(HW)
    inv_c = 1.0 / float(C)

    # Loop-invariant (row, col) index of every flattened spatial position.
    lane = jax.lax.broadcasted_iota(jnp.int32, (1, HW), 1)
    if W & (W - 1) == 0:  # power-of-two fast path (bitwise, no integer div)
        col = lane & (W - 1)
        row = lane >> (W.bit_length() - 1)
    else:
        col = lane % W
        row = lane // W
    # Zero-padding masks for every column / row offset (hoisted, batch-invariant).
    col_ok = [jnp.logical_and(col + (dj - PAD) >= 0, col + (dj - PAD) < W)
              for dj in range(KS)]
    row_ok = [jnp.logical_and(row + (di - PAD) >= 0, row + (di - PAD) < H)
              for di in range(KS)]

    w1 = w1_ref[...]    # (C_r, C)
    w2 = w2_ref[...]    # (C, C_r)
    wsp = wsp_ref[...]  # (2, KS*KS)
    # Hoisted per-tap weight columns: static (2, 1) slices, one per (di, dj).
    w_tap = [[wsp[:, di * KS + dj: di * KS + dj + 1] for dj in range(KS)]
             for di in range(KS)]
    bias = bsp_ref[0]

    for b in range(Bb):  # Bb is small and static
        xb = x_ref[b]  # (C, HW) lane-dense load

        # ---- Channel attention: global max / avg pool over spatial (lane) axis ----
        cmax = jnp.max(xb, axis=1, keepdims=True)              # (C, 1)
        cavg = jnp.sum(xb, axis=1, keepdims=True) * inv_hw     # (C, 1)
        s = jnp.concatenate([cmax, cavg], axis=1)              # (C, 2)
        # Tiny SE MLP; MXU is otherwise idle so two small dots are fine.
        h = jnp.maximum(jnp.dot(w1, s, preferred_element_type=jnp.float32), 0.0)  # (C_r, 2)
        o = jnp.dot(w2, h, preferred_element_type=jnp.float32)                    # (C, 2)
        ca = jax.nn.sigmoid(o[:, 0:1] + o[:, 1:2])                                # (C, 1)

        # ---- Channel-gated features; kept live and reused for the final store ----
        yb = xb * ca                                           # (C, HW)

        # ---- Spatial attention maps stacked into one (2, HW) slab ----
        mmap = jnp.max(yb, axis=0, keepdims=True)              # (1, HW)
        amap = jnp.sum(yb, axis=0, keepdims=True) * inv_c      # (1, HW)
        maps = jnp.concatenate([mmap, amap], axis=0)           # (2, HW)

        # ---- KSxKS conv with zero padding in the flat lane-dense layout ----
        # Column shifts shared by both channels: KS cross-lane rolls total.
        shifted = []
        for dj in range(KS):
            d = dj - PAD
            if d == 0:
                shifted.append(maps)
            else:
                shifted.append(jnp.where(col_ok[dj], _roll_lanes(maps, d), 0.0))
        # Per-di inner sums are pure VPU mul-adds; row shifts are KS more rolls
        # by +-k*W applied to the already dj-combined rows.
        acc = None
        for di in range(KS):
            inner = shifted[0] * w_tap[di][0]
            for dj in range(1, KS):
                inner = inner + shifted[dj] * w_tap[di][dj]
            dr = di - PAD
            if dr == 0:
                term = inner
            else:
                term = jnp.where(row_ok[di], _roll_lanes(inner, dr * W), 0.0)
            acc = term if acc is None else acc + term          # (2, HW)
        conv = acc[0:1] + acc[1:2] + bias                      # (1, HW)
        sa = jax.nn.sigmoid(conv)                              # (1, HW)

        # ---- Final gate: out = (x * ca) * sa  (lane-dense store) ----
        out_ref[b] = (yb * sa).astype(out_ref.dtype)


def cbam_block(x, w1, w2, wsp, bsp, *, kernel_size=7, block_b=None):
    """x: (B, C, H, W) f32. w1: (C_r, C), w2: (C, C_r), wsp: (2, KS, KS), bsp: (1,)."""
    B, C, H, W = x.shape
    HW = H * W
    C_r = w1.shape[0]
    KS = kernel_size

    x2 = x.reshape(B, C, HW)                             # free view of contiguous NCHW
    wsp2 = wsp.reshape(2, KS * KS).astype(jnp.float32)   # (2, KS*KS) VMEM tile
    bsp = bsp.astype(jnp.float32)

    if block_b is None:
        # ~0.5 MB of input per grid step, but keep >= 2 steps when B >= 2 (megacore).
        block_b = max(1, min(B, (512 * 1024) // max(1, C * HW * 4)))
        if block_b > 1 and (B + block_b - 1) // block_b < 2:
            block_b = max(1, B // 2)
    while B % block_b != 0:
        block_b -= 1
    grid = (B // block_b,)

    # TODO(synk): for production sizes (e.g. C>=256, H=W>=56) an H-tiled two-pass
    # (pool pass, then apply pass) variant is needed to stay inside v7x's 64 MiB VMEM.
    kernel = functools.partial(cbam_kernel, H=H, W=W, KS=KS)

    out2 = pl.pallas_call(
        kernel,
        out_shape=jax.ShapeDtypeStruct((B, C, HW), x.dtype),
        grid=grid,
        in_specs=[
            pl.BlockSpec((block_b, C, HW), lambda b: (b, 0, 0)),
            pl.BlockSpec((C_r, C), lambda b: (0, 0)),
            pl.BlockSpec((C, C_r), lambda b: (0, 0)),
            pl.BlockSpec((2, KS * KS), lambda b: (0, 0)),
            pl.BlockSpec(memory_space=pltpu.SMEM),
        ],
        out_specs=pl.BlockSpec((block_b, C, HW), lambda b: (b, 0, 0)),
        compiler_params=pltpu.CompilerParams(
            dimension_semantics=("parallel",),
            vmem_limit_bytes=32 * 1024 * 1024,
        ),
    )(x2, w1, w2, wsp2, bsp)
    return out2.reshape(B, C, H, W)


def cbam_reference(x, w1, w2, wsp, bsp):
    """Pure-JAX reference matching the PyTorch CBAMBlock forward."""
    m = jnp.max(x, axis=(2, 3))   # (B, C)
    a = jnp.mean(x, axis=(2, 3))  # (B, C)

    def se(v):
        h = jnp.maximum(v @ w1.T, 0.0)  # (B, C_r)
        return h @ w2.T                 # (B, C)

    ca = jax.nn.sigmoid(se(m) + se(a))  # (B, C)
    y = x * ca[:, :, None, None]

    mmap = jnp.max(y, axis=1, keepdims=True)
    amap = jnp.mean(y, axis=1, keepdims=True)
    st = jnp.concatenate([mmap, amap], axis=1)  # (B, 2, H, W)
    conv = jax.lax.conv_general_dilated(
        st, wsp.reshape(1, 2, 7, 7), window_strides=(1, 1),
        padding=((3, 3), (3, 3)),
        dimension_numbers=("NCHW", "OIHW", "NCHW")) + bsp.reshape(1, 1, 1, 1)
    sa = jax.nn.sigmoid(conv)
    return y * sa


if __name__ == "__main__":
    B, C, H, W = 2, 64, 16, 16
    reduction, KS = 16, 7
    C_r = C // reduction

    key = jax.random.PRNGKey(0)
    kx, k1, k2, k3, k4 = jax.random.split(key, 5)
    x = jax.random.normal(kx, (B, C, H, W), dtype=jnp.float32)
    w1 = jax.random.normal(k1, (C_r, C), dtype=jnp.float32) * 0.1      # se conv1 (no bias)
    w2 = jax.random.normal(k2, (C, C_r), dtype=jnp.float32) * 0.1      # se conv2 (no bias)
    wsp = jax.random.normal(k3, (2, KS, KS), dtype=jnp.float32) * 0.1  # spatial 7x7 weight
    bsp = jax.random.normal(k4, (1,), dtype=jnp.float32) * 0.1         # spatial conv bias

    out = cbam_block(x, w1, w2, wsp, bsp, kernel_size=KS)
    out = jax.block_until_ready(out)

    ref = jax.block_until_ready(cbam_reference(x, w1, w2, wsp, bsp))
    assert out.shape == (B, C, H, W)
    assert jnp.allclose(out, ref, rtol=1e-4, atol=1e-4), (
        float(jnp.max(jnp.abs(out - ref))))

    print("KERNEL_OK")
</pallas_src>

<mosaic_0001>
module attributes {stable_mosaic.version = 11 : i64} {
  func.func @cbam_kernel(%arg0: i32, %arg1: memref<1x64x256xf32, #tpu.memory_space<vmem>>, %arg2: memref<4x64xf32, #tpu.memory_space<vmem>>, %arg3: memref<64x4xf32, #tpu.memory_space<vmem>>, %arg4: memref<2x49xf32, #tpu.memory_space<vmem>>, %arg5: memref<1xf32, #tpu.memory_space<smem>>, %arg6: memref<1x64x256xf32, #tpu.memory_space<vmem>>) attributes {dimension_semantics = [#tpu.dimension_semantics<parallel>], iteration_bounds = array<i64: 2>, scalar_prefetch = 0 : i64, scratch_operands = 0 : i64, tpu.core_type = #tpu.core_type<tc>, window_params = [{transform_indices = @transform_0, window_bounds = array<i64: 1, 64, 256>}, {pipeline_mode = #tpu.pipeline_mode<synchronous>, transform_indices = @transform_1, window_bounds = array<i64: 4, 64>}, {pipeline_mode = #tpu.pipeline_mode<synchronous>, transform_indices = @transform_2, window_bounds = array<i64: 64, 4>}, {pipeline_mode = #tpu.pipeline_mode<synchronous>, transform_indices = @transform_3, window_bounds = array<i64: 2, 49>}, {transform_indices = @transform_4, window_bounds = array<i64: 1>}, {transform_indices = @transform_5, window_bounds = array<i64: 1, 64, 256>}]} {
    %0 = tpu.iota {dimensions = array<i32: 1>} : vector<1x256xi32>
    %c15_i32 = arith.constant 15 : i32
    %1 = vector.broadcast %c15_i32 : i32 to vector<1x256xi32>
    %2 = arith.andi %0, %1 : vector<1x256xi32>
    %c4_i32 = arith.constant 4 : i32
    %3 = vector.broadcast %c4_i32 : i32 to vector<1x256xi32>
    %4 = arith.shrsi %0, %3 : vector<1x256xi32>
    %c-3_i32 = arith.constant -3 : i32
    %5 = vector.broadcast %c-3_i32 : i32 to vector<1x256xi32>
    %6 = arith.addi %2, %5 : vector<1x256xi32>
    %c0_i32 = arith.constant 0 : i32
    %7 = vector.broadcast %c0_i32 : i32 to vector<1x256xi32>
    %8 = arith.cmpi sge, %6, %7 : vector<1x256xi32>
    %c-3_i32_0 = arith.constant -3 : i32
    %9 = vector.broadcast %c-3_i32_0 : i32 to vector<1x256xi32>
    %10 = arith.addi %2, %9 : vector<1x256xi32>
    %c16_i32 = arith.constant 16 : i32
    %11 = vector.broadcast %c16_i32 : i32 to vector<1x256xi32>
    %12 = arith.cmpi slt, %10, %11 : vector<1x256xi32>
    %13 = arith.andi %8, %12 : vector<1x256xi1>
    %c-2_i32 = arith.constant -2 : i32
    %14 = vector.broadcast %c-2_i32 : i32 to vector<1x256xi32>
    %15 = arith.addi %2, %14 : vector<1x256xi32>
    %c0_i32_1 = arith.constant 0 : i32
    %16 = vector.broadcast %c0_i32_1 : i32 to vector<1x256xi32>
    %17 = arith.cmpi sge, %15, %16 : vector<1x256xi32>
    %c-2_i32_2 = arith.constant -2 : i32
    %18 = vector.broadcast %c-2_i32_2 : i32 to vector<1x256xi32>
    %19 = arith.addi %2, %18 : vector<1x256xi32>
    %c16_i32_3 = arith.constant 16 : i32
    %20 = vector.broadcast %c16_i32_3 : i32 to vector<1x256xi32>
    %21 = arith.cmpi slt, %19, %20 : vector<1x256xi32>
    %22 = arith.andi %17, %21 : vector<1x256xi1>
    %c-1_i32 = arith.constant -1 : i32
    %23 = vector.broadcast %c-1_i32 : i32 to vector<1x256xi32>
    %24 = arith.addi %2, %23 : vector<1x256xi32>
    %c0_i32_4 = arith.constant 0 : i32
    %25 = vector.broadcast %c0_i32_4 : i32 to vector<1x256xi32>
    %26 = arith.cmpi sge, %24, %25 : vector<1x256xi32>
    %c-1_i32_5 = arith.constant -1 : i32
    %27 = vector.broadcast %c-1_i32_5 : i32 to vector<1x256xi32>
    %28 = arith.addi %2, %27 : vector<1x256xi32>
    %c16_i32_6 = arith.constant 16 : i32
    %29 = vector.broadcast %c16_i32_6 : i32 to vector<1x256xi32>
    %30 = arith.cmpi slt, %28, %29 : vector<1x256xi32>
    %31 = arith.andi %26, %30 : vector<1x256xi1>
    %c1_i32 = arith.constant 1 : i32
    %32 = vector.broadcast %c1_i32 : i32 to vector<1x256xi32>
    %33 = arith.addi %2, %32 : vector<1x256xi32>
    %c0_i32_7 = arith.constant 0 : i32
    %34 = vector.broadcast %c0_i32_7 : i32 to vector<1x256xi32>
    %35 = arith.cmpi sge, %33, %34 : vector<1x256xi32>
    %c1_i32_8 = arith.constant 1 : i32
    %36 = vector.broadcast %c1_i32_8 : i32 to vector<1x256xi32>
    %37 = arith.addi %2, %36 : vector<1x256xi32>
    %c16_i32_9 = arith.constant 16 : i32
    %38 = vector.broadcast %c16_i32_9 : i32 to vector<1x256xi32>
    %39 = arith.cmpi slt, %37, %38 : vector<1x256xi32>
    %40 = arith.andi %35, %39 : vector<1x256xi1>
    %c2_i32 = arith.constant 2 : i32
    %41 = vector.broadcast %c2_i32 : i32 to vector<1x256xi32>
    %42 = arith.addi %2, %41 : vector<1x256xi32>
    %c0_i32_10 = arith.constant 0 : i32
    %43 = vector.broadcast %c0_i32_10 : i32 to vector<1x256xi32>
    %44 = arith.cmpi sge, %42, %43 : vector<1x256xi32>
    %c2_i32_11 = arith.constant 2 : i32
    %45 = vector.broadcast %c2_i32_11 : i32 to vector<1x256xi32>
    %46 = arith.addi %2, %45 : vector<1x256xi32>
    %c16_i32_12 = arith.constant 16 : i32
    %47 = vector.broadcast %c16_i32_12 : i32 to vector<1x256xi32>
    %48 = arith.cmpi slt, %46, %47 : vector<1x256xi32>
    %49 = arith.andi %44, %48 : vector<1x256xi1>
    %c3_i32 = arith.constant 3 : i32
    %50 = vector.broadcast %c3_i32 : i32 to vector<1x256xi32>
    %51 = arith.addi %2, %50 : vector<1x256xi32>
    %c0_i32_13 = arith.constant 0 : i32
    %52 = vector.broadcast %c0_i32_13 : i32 to vector<1x256xi32>
    %53 = arith.cmpi sge, %51, %52 : vector<1x256xi32>
    %c3_i32_14 = arith.constant 3 : i32
    %54 = vector.broadcast %c3_i32_14 : i32 to vector<1x256xi32>
    %55 = arith.addi %2, %54 : vector<1x256xi32>
    %c16_i32_15 = arith.constant 16 : i32
    %56 = vector.broadcast %c16_i32_15 : i32 to vector<1x256xi32>
    %57 = arith.cmpi slt, %55, %56 : vector<1x256xi32>
    %58 = arith.andi %53, %57 : vector<1x256xi1>
    %c-3_i32_16 = arith.constant -3 : i32
    %59 = vector.broadcast %c-3_i32_16 : i32 to vector<1x256xi32>
    %60 = arith.addi %4, %59 : vector<1x256xi32>
    %c0_i32_17 = arith.constant 0 : i32
    %61 = vector.broadcast %c0_i32_17 : i32 to vector<1x256xi32>
    %62 = arith.cmpi sge, %60, %61 : vector<1x256xi32>
    %c-3_i32_18 = arith.constant -3 : i32
    %63 = vector.broadcast %c-3_i32_18 : i32 to vector<1x256xi32>
    %64 = arith.addi %4, %63 : vector<1x256xi32>
    %c16_i32_19 = arith.constant 16 : i32
    %65 = vector.broadcast %c16_i32_19 : i32 to vector<1x256xi32>
    %66 = arith.cmpi slt, %64, %65 : vector<1x256xi32>
    %67 = arith.andi %62, %66 : vector<1x256xi1>
    %c-2_i32_20 = arith.constant -2 : i32
    %68 = vector.broadcast %c-2_i32_20 : i32 to vector<1x256xi32>
    %69 = arith.addi %4, %68 : vector<1x256xi32>
    %c0_i32_21 = arith.constant 0 : i32
    %70 = vector.broadcast %c0_i32_21 : i32 to vector<1x256xi32>
    %71 = arith.cmpi sge, %69, %70 : vector<1x256xi32>
    %c-2_i32_22 = arith.constant -2 : i32
    %72 = vector.broadcast %c-2_i32_22 : i32 to vector<1x256xi32>
    %73 = arith.addi %4, %72 : vector<1x256xi32>
    %c16_i32_23 = arith.constant 16 : i32
    %74 = vector.broadcast %c16_i32_23 : i32 to vector<1x256xi32>
    %75 = arith.cmpi slt, %73, %74 : vector<1x256xi32>
    %76 = arith.andi %71, %75 : vector<1x256xi1>
    %c-1_i32_24 = arith.constant -1 : i32
    %77 = vector.broadcast %c-1_i32_24 : i32 to vector<1x256xi32>
    %78 = arith.addi %4, %77 : vector<1x256xi32>
    %c0_i32_25 = arith.constant 0 : i32
    %79 = vector.broadcast %c0_i32_25 : i32 to vector<1x256xi32>
    %80 = arith.cmpi sge, %78, %79 : vector<1x256xi32>
    %c-1_i32_26 = arith.constant -1 : i32
    %81 = vector.broadcast %c-1_i32_26 : i32 to vector<1x256xi32>
    %82 = arith.addi %4, %81 : vector<1x256xi32>
    %c16_i32_27 = arith.constant 16 : i32
    %83 = vector.broadcast %c16_i32_27 : i32 to vector<1x256xi32>
    %84 = arith.cmpi slt, %82, %83 : vector<1x256xi32>
    %85 = arith.andi %80, %84 : vector<1x256xi1>
    %c1_i32_28 = arith.constant 1 : i32
    %86 = vector.broadcast %c1_i32_28 : i32 to vector<1x256xi32>
    %87 = arith.addi %4, %86 : vector<1x256xi32>
    %c0_i32_29 = arith.constant 0 : i32
    %88 = vector.broadcast %c0_i32_29 : i32 to vector<1x256xi32>
    %89 = arith.cmpi sge, %87, %88 : vector<1x256xi32>
    %c1_i32_30 = arith.constant 1 : i32
    %90 = vector.broadcast %c1_i32_30 : i32 to vector<1x256xi32>
    %91 = arith.addi %4, %90 : vector<1x256xi32>
    %c16_i32_31 = arith.constant 16 : i32
    %92 = vector.broadcast %c16_i32_31 : i32 to vector<1x256xi32>
    %93 = arith.cmpi slt, %91, %92 : vector<1x256xi32>
    %94 = arith.andi %89, %93 : vector<1x256xi1>
    %c2_i32_32 = arith.constant 2 : i32
    %95 = vector.broadcast %c2_i32_32 : i32 to vector<1x256xi32>
    %96 = arith.addi %4, %95 : vector<1x256xi32>
    %c0_i32_33 = arith.constant 0 : i32
    %97 = vector.broadcast %c0_i32_33 : i32 to vector<1x256xi32>
    %98 = arith.cmpi sge, %96, %97 : vector<1x256xi32>
    %c2_i32_34 = arith.constant 2 : i32
    %99 = vector.broadcast %c2_i32_34 : i32 to vector<1x256xi32>
    %100 = arith.addi %4, %99 : vector<1x256xi32>
    %c16_i32_35 = arith.constant 16 : i32
    %101 = vector.broadcast %c16_i32_35 : i32 to vector<1x256xi32>
    %102 = arith.cmpi slt, %100, %101 : vector<1x256xi32>
    %103 = arith.andi %98, %102 : vector<1x256xi1>
    %c3_i32_36 = arith.constant 3 : i32
    %104 = vector.broadcast %c3_i32_36 : i32 to vector<1x256xi32>
    %105 = arith.addi %4, %104 : vector<1x256xi32>
    %c0_i32_37 = arith.constant 0 : i32
    %106 = vector.broadcast %c0_i32_37 : i32 to vector<1x256xi32>
    %107 = arith.cmpi sge, %105, %106 : vector<1x256xi32>
    %c3_i32_38 = arith.constant 3 : i32
    %108 = vector.broadcast %c3_i32_38 : i32 to vector<1x256xi32>
    %109 = arith.addi %4, %108 : vector<1x256xi32>
    %c16_i32_39 = arith.constant 16 : i32
    %110 = vector.broadcast %c16_i32_39 : i32 to vector<1x256xi32>
    %111 = arith.cmpi slt, %109, %110 : vector<1x256xi32>
    %112 = arith.andi %107, %111 : vector<1x256xi1>
    %c0 = arith.constant 0 : index
    %c0_40 = arith.constant 0 : index
    %113 = vector.load %arg2[%c0, %c0_40] : memref<4x64xf32, #tpu.memory_space<vmem>>, vector<4x64xf32>
    %c0_41 = arith.constant 0 : index
    %c0_42 = arith.constant 0 : index
    %114 = vector.load %arg3[%c0_41, %c0_42] : memref<64x4xf32, #tpu.memory_space<vmem>>, vector<64x4xf32>
    %c0_43 = arith.constant 0 : index
    %c0_44 = arith.constant 0 : index
    %115 = vector.load %arg4[%c0_43, %c0_44] : memref<2x49xf32, #tpu.memory_space<vmem>>, vector<2x49xf32>
    %116 = vector.extract_strided_slice %115 {offsets = [0, 0], sizes = [2, 1], strides = [1, 1]} : vector<2x49xf32> to vector<2x1xf32>
    %117 = vector.extract_strided_slice %115 {offsets = [0, 1], sizes = [2, 1], strides = [1, 1]} : vector<2x49xf32> to vector<2x1xf32>
    %118 = vector.extract_strided_slice %115 {offsets = [0, 2], sizes = [2, 1], strides = [1, 1]} : vector<2x49xf32> to vector<2x1xf32>
    %119 = vector.extract_strided_slice %115 {offsets = [0, 3], sizes = [2, 1], strides = [1, 1]} : vector<2x49xf32> to vector<2x1xf32>
    %120 = vector.extract_strided_slice %115 {offsets = [0, 4], sizes = [2, 1], strides = [1, 1]} : vector<2x49xf32> to vector<2x1xf32>
    %121 = vector.extract_strided_slice %115 {offsets = [0, 5], sizes = [2, 1], strides = [1, 1]} : vector<2x49xf32> to vector<2x1xf32>
    %122 = vector.extract_strided_slice %115 {offsets = [0, 6], sizes = [2, 1], strides = [1, 1]} : vector<2x49xf32> to vector<2x1xf32>
    %123 = vector.extract_strided_slice %115 {offsets = [0, 7], sizes = [2, 1], strides = [1, 1]} : vector<2x49xf32> to vector<2x1xf32>
    %124 = vector.extract_strided_slice %115 {offsets = [0, 8], sizes = [2, 1], strides = [1, 1]} : vector<2x49xf32> to vector<2x1xf32>
    %125 = vector.extract_strided_slice %115 {offsets = [0, 9], sizes = [2, 1], strides = [1, 1]} : vector<2x49xf32> to vector<2x1xf32>
    %126 = vector.extract_strided_slice %115 {offsets = [0, 10], sizes = [2, 1], strides = [1, 1]} : vector<2x49xf32> to vector<2x1xf32>
    %127 = vector.extract_strided_slice %115 {offsets = [0, 11], sizes = [2, 1], strides = [1, 1]} : vector<2x49xf32> to vector<2x1xf32>
    %128 = vector.extract_strided_slice %115 {offsets = [0, 12], sizes = [2, 1], strides = [1, 1]} : vector<2x49xf32> to vector<2x1xf32>
    %129 = vector.extract_strided_slice %115 {offsets = [0, 13], sizes = [2, 1], strides = [1, 1]} : vector<2x49xf32> to vector<2x1xf32>
    %130 = vector.extract_strided_slice %115 {offsets = [0, 14], sizes = [2, 1], strides = [1, 1]} : vector<2x49xf32> to vector<2x1xf32>
    %131 = vector.extract_strided_slice %115 {offsets = [0, 15], sizes = [2, 1], strides = [1, 1]} : vector<2x49xf32> to vector<2x1xf32>
    %132 = vector.extract_strided_slice %115 {offsets = [0, 16], sizes = [2, 1], strides = [1, 1]} : vector<2x49xf32> to vector<2x1xf32>
    %133 = vector.extract_strided_slice %115 {offsets = [0, 17], sizes = [2, 1], strides = [1, 1]} : vector<2x49xf32> to vector<2x1xf32>
    %134 = vector.extract_strided_slice %115 {offsets = [0, 18], sizes = [2, 1], strides = [1, 1]} : vector<2x49xf32> to vector<2x1xf32>
    %135 = vector.extract_strided_slice %115 {offsets = [0, 19], sizes = [2, 1], strides = [1, 1]} : vector<2x49xf32> to vector<2x1xf32>
    %136 = vector.extract_strided_slice %115 {offsets = [0, 20], sizes = [2, 1], strides = [1, 1]} : vector<2x49xf32> to vector<2x1xf32>
    %137 = vector.extract_strided_slice %115 {offsets = [0, 21], sizes = [2, 1], strides = [1, 1]} : vector<2x49xf32> to vector<2x1xf32>
    %138 = vector.extract_strided_slice %115 {offsets = [0, 22], sizes = [2, 1], strides = [1, 1]} : vector<2x49xf32> to vector<2x1xf32>
    %139 = vector.extract_strided_slice %115 {offsets = [0, 23], sizes = [2, 1], strides = [1, 1]} : vector<2x49xf32> to vector<2x1xf32>
    %140 = vector.extract_strided_slice %115 {offsets = [0, 24], sizes = [2, 1], strides = [1, 1]} : vector<2x49xf32> to vector<2x1xf32>
    %141 = vector.extract_strided_slice %115 {offsets = [0, 25], sizes = [2, 1], strides = [1, 1]} : vector<2x49xf32> to vector<2x1xf32>
    %142 = vector.extract_strided_slice %115 {offsets = [0, 26], sizes = [2, 1], strides = [1, 1]} : vector<2x49xf32> to vector<2x1xf32>
    %143 = vector.extract_strided_slice %115 {offsets = [0, 27], sizes = [2, 1], strides = [1, 1]} : vector<2x49xf32> to vector<2x1xf32>
    %144 = vector.extract_strided_slice %115 {offsets = [0, 28], sizes = [2, 1], strides = [1, 1]} : vector<2x49xf32> to vector<2x1xf32>
    %145 = vector.extract_strided_slice %115 {offsets = [0, 29], sizes = [2, 1], strides = [1, 1]} : vector<2x49xf32> to vector<2x1xf32>
    %146 = vector.extract_strided_slice %115 {offsets = [0, 30], sizes = [2, 1], strides = [1, 1]} : vector<2x49xf32> to vector<2x1xf32>
    %147 = vector.extract_strided_slice %115 {offsets = [0, 31], sizes = [2, 1], strides = [1, 1]} : vector<2x49xf32> to vector<2x1xf32>
    %148 = vector.extract_strided_slice %115 {offsets = [0, 32], sizes = [2, 1], strides = [1, 1]} : vector<2x49xf32> to vector<2x1xf32>
    %149 = vector.extract_strided_slice %115 {offsets = [0, 33], sizes = [2, 1], strides = [1, 1]} : vector<2x49xf32> to vector<2x1xf32>
    %150 = vector.extract_strided_slice %115 {offsets = [0, 34], sizes = [2, 1], strides = [1, 1]} : vector<2x49xf32> to vector<2x1xf32>
    %151 = vector.extract_strided_slice %115 {offsets = [0, 35], sizes = [2, 1], strides = [1, 1]} : vector<2x49xf32> to vector<2x1xf32>
    %152 = vector.extract_strided_slice %115 {offsets = [0, 36], sizes = [2, 1], strides = [1, 1]} : vector<2x49xf32> to vector<2x1xf32>
    %153 = vector.extract_strided_slice %115 {offsets = [0, 37], sizes = [2, 1], strides = [1, 1]} : vector<2x49xf32> to vector<2x1xf32>
    %154 = vector.extract_strided_slice %115 {offsets = [0, 38], sizes = [2, 1], strides = [1, 1]} : vector<2x49xf32> to vector<2x1xf32>
    %155 = vector.extract_strided_slice %115 {offsets = [0, 39], sizes = [2, 1], strides = [1, 1]} : vector<2x49xf32> to vector<2x1xf32>
    %156 = vector.extract_strided_slice %115 {offsets = [0, 40], sizes = [2, 1], strides = [1, 1]} : vector<2x49xf32> to vector<2x1xf32>
    %157 = vector.extract_strided_slice %115 {offsets = [0, 41], sizes = [2, 1], strides = [1, 1]} : vector<2x49xf32> to vector<2x1xf32>
    %158 = vector.extract_strided_slice %115 {offsets = [0, 42], sizes = [2, 1], strides = [1, 1]} : vector<2x49xf32> to vector<2x1xf32>
    %159 = vector.extract_strided_slice %115 {offsets = [0, 43], sizes = [2, 1], strides = [1, 1]} : vector<2x49xf32> to vector<2x1xf32>
    %160 = vector.extract_strided_slice %115 {offsets = [0, 44], sizes = [2, 1], strides = [1, 1]} : vector<2x49xf32> to vector<2x1xf32>
    %161 = vector.extract_strided_slice %115 {offsets = [0, 45], sizes = [2, 1], strides = [1, 1]} : vector<2x49xf32> to vector<2x1xf32>
    %162 = vector.extract_strided_slice %115 {offsets = [0, 46], sizes = [2, 1], strides = [1, 1]} : vector<2x49xf32> to vector<2x1xf32>
    %163 = vector.extract_strided_slice %115 {offsets = [0, 47], sizes = [2, 1], strides = [1, 1]} : vector<2x49xf32> to vector<2x1xf32>
    %164 = vector.extract_strided_slice %115 {offsets = [0, 48], sizes = [2, 1], strides = [1, 1]} : vector<2x49xf32> to vector<2x1xf32>
    %c0_45 = arith.constant 0 : index
    %165 = memref.load %arg5[%c0_45] : memref<1xf32, #tpu.memory_space<smem>>
    %c0_46 = arith.constant 0 : index
    %c0_47 = arith.constant 0 : index
    %c0_48 = arith.constant 0 : index
    %166 = vector.load %arg1[%c0_46, %c0_47, %c0_48] : memref<1x64x256xf32, #tpu.memory_space<vmem>>, vector<1x64x256xf32>
    %167 = vector.shape_cast %166 : vector<1x64x256xf32> to vector<64x256xf32>
    %cst = arith.constant dense<0xFF800000> : vector<64xf32>
    %168 = vector.multi_reduction <maximumf>, %167, %cst [1] : vector<64x256xf32> to vector<64xf32>
    %169 = vector.shape_cast %168 : vector<64xf32> to vector<64x1xf32>
    %cst_49 = arith.constant dense<0.000000e+00> : vector<64xf32>
    %170 = vector.multi_reduction <add>, %167, %cst_49 [1] : vector<64x256xf32> to vector<64xf32>
    %171 = vector.shape_cast %170 : vector<64xf32> to vector<64x1xf32>
    %cst_50 = arith.constant 3.906250e-03 : f32
    %172 = vector.broadcast %cst_50 : f32 to vector<64x1xf32>
    %173 = arith.mulf %171, %172 : vector<64x1xf32>
    %174 = tpu.concatenate %169, %173 in 1 : vector<64x1xf32>, vector<64x1xf32> -> vector<64x2xf32>
    %cst_51 = arith.constant dense<0.000000e+00> : vector<4x2xf32>
    %175 = tpu.matmul %113, %174, %cst_51 {dimension_numbers = #tpu.dot_dimension_numbers<[1], [0], [0], [1], [0, 0, 1, 1], [], []>} : vector<4x64xf32>, vector<64x2xf32>, vector<4x2xf32> -> vector<4x2xf32>
    %cst_52 = arith.constant 0.000000e+00 : f32
    %176 = vector.broadcast %cst_52 : f32 to vector<4x2xf32>
    %177 = arith.maximumf %175, %176 : vector<4x2xf32>
    %cst_53 = arith.constant dense<0.000000e+00> : vector<64x2xf32>
    %178 = tpu.matmul %114, %177, %cst_53 {dimension_numbers = #tpu.dot_dimension_numbers<[1], [0], [0], [1], [0, 0, 1, 1], [], []>} : vector<64x4xf32>, vector<4x2xf32>, vector<64x2xf32> -> vector<64x2xf32>
    %179 = vector.extract_strided_slice %178 {offsets = [0, 0], sizes = [64, 1], strides = [1, 1]} : vector<64x2xf32> to vector<64x1xf32>
    %180 = vector.extract_strided_slice %178 {offsets = [0, 1], sizes = [64, 1], strides = [1, 1]} : vector<64x2xf32> to vector<64x1xf32>
    %181 = arith.addf %179, %180 : vector<64x1xf32>
    %182 = arith.negf %181 : vector<64x1xf32>
    %183 = math.exp %182 : vector<64x1xf32>
    %cst_54 = arith.constant 1.000000e+00 : f32
    %184 = vector.broadcast %cst_54 : f32 to vector<64x1xf32>
    %185 = arith.addf %184, %183 : vector<64x1xf32>
    %186 = arith.divf %184, %185 : vector<64x1xf32>
    %187 = vector.broadcast %186 : vector<64x1xf32> to vector<64x256xf32>
    %188 = arith.mulf %167, %187 : vector<64x256xf32>
    %cst_55 = arith.constant dense<0xFF800000> : vector<256xf32>
    %189 = vector.multi_reduction <maximumf>, %188, %cst_55 [0] : vector<64x256xf32> to vector<256xf32>
    %190 = vector.shape_cast %189 : vector<256xf32> to vector<1x256xf32>
    %cst_56 = arith.constant dense<0.000000e+00> : vector<256xf32>
    %191 = vector.multi_reduction <add>, %188, %cst_56 [0] : vector<64x256xf32> to vector<256xf32>
    %192 = vector.shape_cast %191 : vector<256xf32> to vector<1x256xf32>
    %cst_57 = arith.constant 1.562500e-02 : f32
    %193 = vector.broadcast %cst_57 : f32 to vector<1x256xf32>
    %194 = arith.mulf %192, %193 : vector<1x256xf32>
    %195 = tpu.concatenate %190, %194 in 0 : vector<1x256xf32>, vector<1x256xf32> -> vector<2x256xf32>
    %196 = vector.extract_strided_slice %195 {offsets = [0, 253], sizes = [2, 3], strides = [1, 1]} : vector<2x256xf32> to vector<2x3xf32>
    %197 = vector.extract_strided_slice %195 {offsets = [0, 0], sizes = [2, 253], strides = [1, 1]} : vector<2x256xf32> to vector<2x253xf32>
    %198 = tpu.concatenate %196, %197 in 1 : vector<2x3xf32>, vector<2x253xf32> -> vector<2x256xf32>
    %cst_58 = arith.constant 0.000000e+00 : f32
    %199 = vector.shape_cast %13 : vector<1x256xi1> to vector<1x256xi1>
    %200 = vector.broadcast %199 : vector<1x256xi1> to vector<2x256xi1>
    %201 = vector.broadcast %cst_58 : f32 to vector<2x256xf32>
    %202 = arith.select %200, %198, %201 : vector<2x256xi1>, vector<2x256xf32>
    %203 = vector.extract_strided_slice %195 {offsets = [0, 254], sizes = [2, 2], strides = [1, 1]} : vector<2x256xf32> to vector<2x2xf32>
    %204 = vector.extract_strided_slice %195 {offsets = [0, 0], sizes = [2, 254], strides = [1, 1]} : vector<2x256xf32> to vector<2x254xf32>
    %205 = tpu.concatenate %203, %204 in 1 : vector<2x2xf32>, vector<2x254xf32> -> vector<2x256xf32>
    %cst_59 = arith.constant 0.000000e+00 : f32
    %206 = vector.shape_cast %22 : vector<1x256xi1> to vector<1x256xi1>
    %207 = vector.broadcast %206 : vector<1x256xi1> to vector<2x256xi1>
    %208 = vector.broadcast %cst_59 : f32 to vector<2x256xf32>
    %209 = arith.select %207, %205, %208 : vector<2x256xi1>, vector<2x256xf32>
    %210 = vector.extract_strided_slice %195 {offsets = [0, 255], sizes = [2, 1], strides = [1, 1]} : vector<2x256xf32> to vector<2x1xf32>
    %211 = vector.extract_strided_slice %195 {offsets = [0, 0], sizes = [2, 255], strides = [1, 1]} : vector<2x256xf32> to vector<2x255xf32>
    %212 = tpu.concatenate %210, %211 in 1 : vector<2x1xf32>, vector<2x255xf32> -> vector<2x256xf32>
    %cst_60 = arith.constant 0.000000e+00 : f32
    %213 = vector.shape_cast %31 : vector<1x256xi1> to vector<1x256xi1>
    %214 = vector.broadcast %213 : vector<1x256xi1> to vector<2x256xi1>
    %215 = vector.broadcast %cst_60 : f32 to vector<2x256xf32>
    %216 = arith.select %214, %212, %215 : vector<2x256xi1>, vector<2x256xf32>
    %217 = vector.extract_strided_slice %195 {offsets = [0, 1], sizes = [2, 255], strides = [1, 1]} : vector<2x256xf32> to vector<2x255xf32>
    %218 = vector.extract_strided_slice %195 {offsets = [0, 0], sizes = [2, 1], strides = [1, 1]} : vector<2x256xf32> to vector<2x1xf32>
    %219 = tpu.concatenate %217, %218 in 1 : vector<2x255xf32>, vector<2x1xf32> -> vector<2x256xf32>
    %cst_61 = arith.constant 0.000000e+00 : f32
    %220 = vector.shape_cast %40 : vector<1x256xi1> to vector<1x256xi1>
    %221 = vector.broadcast %220 : vector<1x256xi1> to vector<2x256xi1>
    %222 = vector.broadcast %cst_61 : f32 to vector<2x256xf32>
    %223 = arith.select %221, %219, %222 : vector<2x256xi1>, vector<2x256xf32>
    %224 = vector.extract_strided_slice %195 {offsets = [0, 2], sizes = [2, 254], strides = [1, 1]} : vector<2x256xf32> to vector<2x254xf32>
    %225 = vector.extract_strided_slice %195 {offsets = [0, 0], sizes = [2, 2], strides = [1, 1]} : vector<2x256xf32> to vector<2x2xf32>
    %226 = tpu.concatenate %224, %225 in 1 : vector<2x254xf32>, vector<2x2xf32> -> vector<2x256xf32>
    %cst_62 = arith.constant 0.000000e+00 : f32
    %227 = vector.shape_cast %49 : vector<1x256xi1> to vector<1x256xi1>
    %228 = vector.broadcast %227 : vector<1x256xi1> to vector<2x256xi1>
    %229 = vector.broadcast %cst_62 : f32 to vector<2x256xf32>
    %230 = arith.select %228, %226, %229 : vector<2x256xi1>, vector<2x256xf32>
    %231 = vector.extract_strided_slice %195 {offsets = [0, 3], sizes = [2, 253], strides = [1, 1]} : vector<2x256xf32> to vector<2x253xf32>
    %232 = vector.extract_strided_slice %195 {offsets = [0, 0], sizes = [2, 3], strides = [1, 1]} : vector<2x256xf32> to vector<2x3xf32>
    %233 = tpu.concatenate %231, %232 in 1 : vector<2x253xf32>, vector<2x3xf32> -> vector<2x256xf32>
    %cst_63 = arith.constant 0.000000e+00 : f32
    %234 = vector.shape_cast %58 : vector<1x256xi1> to vector<1x256xi1>
    %235 = vector.broadcast %234 : vector<1x256xi1> to vector<2x256xi1>
    %236 = vector.broadcast %cst_63 : f32 to vector<2x256xf32>
    %237 = arith.select %235, %233, %236 : vector<2x256xi1>, vector<2x256xf32>
    %238 = vector.broadcast %116 : vector<2x1xf32> to vector<2x256xf32>
    %239 = arith.mulf %202, %238 : vector<2x256xf32>
    %240 = vector.broadcast %117 : vector<2x1xf32> to vector<2x256xf32>
    %241 = arith.mulf %209, %240 : vector<2x256xf32>
    %242 = arith.addf %239, %241 : vector<2x256xf32>
    %243 = vector.broadcast %118 : vector<2x1xf32> to vector<2x256xf32>
    %244 = arith.mulf %216, %243 : vector<2x256xf32>
    %245 = arith.addf %242, %244 : vector<2x256xf32>
    %246 = vector.broadcast %119 : vector<2x1xf32> to vector<2x256xf32>
    %247 = arith.mulf %195, %246 : vector<2x256xf32>
    %248 = arith.addf %245, %247 : vector<2x256xf32>
    %249 = vector.broadcast %120 : vector<2x1xf32> to vector<2x256xf32>
    %250 = arith.mulf %223, %249 : vector<2x256xf32>
    %251 = arith.addf %248, %250 : vector<2x256xf32>
    %252 = vector.broadcast %121 : vector<2x1xf32> to vector<2x256xf32>
    %253 = arith.mulf %230, %252 : vector<2x256xf32>
    %254 = arith.addf %251, %253 : vector<2x256xf32>
    %255 = vector.broadcast %122 : vector<2x1xf32> to vector<2x256xf32>
    %256 = arith.mulf %237, %255 : vector<2x256xf32>
    %257 = arith.addf %254, %256 : vector<2x256xf32>
    %258 = vector.extract_strided_slice %257 {offsets = [0, 208], sizes = [2, 48], strides = [1, 1]} : vector<2x256xf32> to vector<2x48xf32>
    %259 = vector.extract_strided_slice %257 {offsets = [0, 0], sizes = [2, 208], strides = [1, 1]} : vector<2x256xf32> to vector<2x208xf32>
    %260 = tpu.concatenate %258, %259 in 1 : vector<2x48xf32>, vector<2x208xf32> -> vector<2x256xf32>
    %cst_64 = arith.constant 0.000000e+00 : f32
    %261 = vector.shape_cast %67 : vector<1x256xi1> to vector<1x256xi1>
    %262 = vector.broadcast %261 : vector<1x256xi1> to vector<2x256xi1>
    %263 = vector.broadcast %cst_64 : f32 to vector<2x256xf32>
    %264 = arith.select %262, %260, %263 : vector<2x256xi1>, vector<2x256xf32>
    %265 = vector.broadcast %123 : vector<2x1xf32> to vector<2x256xf32>
    %266 = arith.mulf %202, %265 : vector<2x256xf32>
    %267 = vector.broadcast %124 : vector<2x1xf32> to vector<2x256xf32>
    %268 = arith.mulf %209, %267 : vector<2x256xf32>
    %269 = arith.addf %266, %268 : vector<2x256xf32>
    %270 = vector.broadcast %125 : vector<2x1xf32> to vector<2x256xf32>
    %271 = arith.mulf %216, %270 : vector<2x256xf32>
    %272 = arith.addf %269, %271 : vector<2x256xf32>
    %273 = vector.broadcast %126 : vector<2x1xf32> to vector<2x256xf32>
    %274 = arith.mulf %195, %273 : vector<2x256xf32>
    %275 = arith.addf %272, %274 : vector<2x256xf32>
    %276 = vector.broadcast %127 : vector<2x1xf32> to vector<2x256xf32>
    %277 = arith.mulf %223, %276 : vector<2x256xf32>
    %278 = arith.addf %275, %277 : vector<2x256xf32>
    %279 = vector.broadcast %128 : vector<2x1xf32> to vector<2x256xf32>
    %280 = arith.mulf %230, %279 : vector<2x256xf32>
    %281 = arith.addf %278, %280 : vector<2x256xf32>
    %282 = vector.broadcast %129 : vector<2x1xf32> to vector<2x256xf32>
    %283 = arith.mulf %237, %282 : vector<2x256xf32>
    %284 = arith.addf %281, %283 : vector<2x256xf32>
    %285 = vector.extract_strided_slice %284 {offsets = [0, 224], sizes = [2, 32], strides = [1, 1]} : vector<2x256xf32> to vector<2x32xf32>
    %286 = vector.extract_strided_slice %284 {offsets = [0, 0], sizes = [2, 224], strides = [1, 1]} : vector<2x256xf32> to vector<2x224xf32>
    %287 = tpu.concatenate %285, %286 in 1 : vector<2x32xf32>, vector<2x224xf32> -> vector<2x256xf32>
    %cst_65 = arith.constant 0.000000e+00 : f32
    %288 = vector.shape_cast %76 : vector<1x256xi1> to vector<1x256xi1>
    %289 = vector.broadcast %288 : vector<1x256xi1> to vector<2x256xi1>
    %290 = vector.broadcast %cst_65 : f32 to vector<2x256xf32>
    %291 = arith.select %289, %287, %290 : vector<2x256xi1>, vector<2x256xf32>
    %292 = arith.addf %264, %291 : vector<2x256xf32>
    %293 = vector.broadcast %130 : vector<2x1xf32> to vector<2x256xf32>
    %294 = arith.mulf %202, %293 : vector<2x256xf32>
    %295 = vector.broadcast %131 : vector<2x1xf32> to vector<2x256xf32>
    %296 = arith.mulf %209, %295 : vector<2x256xf32>
    %297 = arith.addf %294, %296 : vector<2x256xf32>
    %298 = vector.broadcast %132 : vector<2x1xf32> to vector<2x256xf32>
    %299 = arith.mulf %216, %298 : vector<2x256xf32>
    %300 = arith.addf %297, %299 : vector<2x256xf32>
    %301 = vector.broadcast %133 : vector<2x1xf32> to vector<2x256xf32>
    %302 = arith.mulf %195, %301 : vector<2x256xf32>
    %303 = arith.addf %300, %302 : vector<2x256xf32>
    %304 = vector.broadcast %134 : vector<2x1xf32> to vector<2x256xf32>
    %305 = arith.mulf %223, %304 : vector<2x256xf32>
    %306 = arith.addf %303, %305 : vector<2x256xf32>
    %307 = vector.broadcast %135 : vector<2x1xf32> to vector<2x256xf32>
    %308 = arith.mulf %230, %307 : vector<2x256xf32>
    %309 = arith.addf %306, %308 : vector<2x256xf32>
    %310 = vector.broadcast %136 : vector<2x1xf32> to vector<2x256xf32>
    %311 = arith.mulf %237, %310 : vector<2x256xf32>
    %312 = arith.addf %309, %311 : vector<2x256xf32>
    %313 = vector.extract_strided_slice %312 {offsets = [0, 240], sizes = [2, 16], strides = [1, 1]} : vector<2x256xf32> to vector<2x16xf32>
    %314 = vector.extract_strided_slice %312 {offsets = [0, 0], sizes = [2, 240], strides = [1, 1]} : vector<2x256xf32> to vector<2x240xf32>
    %315 = tpu.concatenate %313, %314 in 1 : vector<2x16xf32>, vector<2x240xf32> -> vector<2x256xf32>
    %cst_66 = arith.constant 0.000000e+00 : f32
    %316 = vector.shape_cast %85 : vector<1x256xi1> to vector<1x256xi1>
    %317 = vector.broadcast %316 : vector<1x256xi1> to vector<2x256xi1>
    %318 = vector.broadcast %cst_66 : f32 to vector<2x256xf32>
    %319 = arith.select %317, %315, %318 : vector<2x256xi1>, vector<2x256xf32>
    %320 = arith.addf %292, %319 : vector<2x256xf32>
    %321 = vector.broadcast %137 : vector<2x1xf32> to vector<2x256xf32>
    %322 = arith.mulf %202, %321 : vector<2x256xf32>
    %323 = vector.broadcast %138 : vector<2x1xf32> to vector<2x256xf32>
    %324 = arith.mulf %209, %323 : vector<2x256xf32>
    %325 = arith.addf %322, %324 : vector<2x256xf32>
    %326 = vector.broadcast %139 : vector<2x1xf32> to vector<2x256xf32>
    %327 = arith.mulf %216, %326 : vector<2x256xf32>
    %328 = arith.addf %325, %327 : vector<2x256xf32>
    %329 = vector.broadcast %140 : vector<2x1xf32> to vector<2x256xf32>
    %330 = arith.mulf %195, %329 : vector<2x256xf32>
    %331 = arith.addf %328, %330 : vector<2x256xf32>
    %332 = vector.broadcast %141 : vector<2x1xf32> to vector<2x256xf32>
    %333 = arith.mulf %223, %332 : vector<2x256xf32>
    %334 = arith.addf %331, %333 : vector<2x256xf32>
    %335 = vector.broadcast %142 : vector<2x1xf32> to vector<2x256xf32>
    %336 = arith.mulf %230, %335 : vector<2x256xf32>
    %337 = arith.addf %334, %336 : vector<2x256xf32>
    %338 = vector.broadcast %143 : vector<2x1xf32> to vector<2x256xf32>
    %339 = arith.mulf %237, %338 : vector<2x256xf32>
    %340 = arith.addf %337, %339 : vector<2x256xf32>
    %341 = arith.addf %320, %340 : vector<2x256xf32>
    %342 = vector.broadcast %144 : vector<2x1xf32> to vector<2x256xf32>
    %343 = arith.mulf %202, %342 : vector<2x256xf32>
    %344 = vector.broadcast %145 : vector<2x1xf32> to vector<2x256xf32>
    %345 = arith.mulf %209, %344 : vector<2x256xf32>
    %346 = arith.addf %343, %345 : vector<2x256xf32>
    %347 = vector.broadcast %146 : vector<2x1xf32> to vector<2x256xf32>
    %348 = arith.mulf %216, %347 : vector<2x256xf32>
    %349 = arith.addf %346, %348 : vector<2x256xf32>
    %350 = vector.broadcast %147 : vector<2x1xf32> to vector<2x256xf32>
    %351 = arith.mulf %195, %350 : vector<2x256xf32>
    %352 = arith.addf %349, %351 : vector<2x256xf32>
    %353 = vector.broadcast %148 : vector<2x1xf32> to vector<2x256xf32>
    %354 = arith.mulf %223, %353 : vector<2x256xf32>
    %355 = arith.addf %352, %354 : vector<2x256xf32>
    %356 = vector.broadcast %149 : vector<2x1xf32> to vector<2x256xf32>
    %357 = arith.mulf %230, %356 : vector<2x256xf32>
    %358 = arith.addf %355, %357 : vector<2x256xf32>
    %359 = vector.broadcast %150 : vector<2x1xf32> to vector<2x256xf32>
    %360 = arith.mulf %237, %359 : vector<2x256xf32>
    %361 = arith.addf %358, %360 : vector<2x256xf32>
    %362 = vector.extract_strided_slice %361 {offsets = [0, 16], sizes = [2, 240], strides = [1, 1]} : vector<2x256xf32> to vector<2x240xf32>
    %363 = vector.extract_strided_slice %361 {offsets = [0, 0], sizes = [2, 16], strides = [1, 1]} : vector<2x256xf32> to vector<2x16xf32>
    %364 = tpu.concatenate %362, %363 in 1 : vector<2x240xf32>, vector<2x16xf32> -> vector<2x256xf32>
    %cst_67 = arith.constant 0.000000e+00 : f32
    %365 = vector.shape_cast %94 : vector<1x256xi1> to vector<1x256xi1>
    %366 = vector.broadcast %365 : vector<1x256xi1> to vector<2x256xi1>
    %367 = vector.broadcast %cst_67 : f32 to vector<2x256xf32>
    %368 = arith.select %366, %364, %367 : vector<2x256xi1>, vector<2x256xf32>
    %369 = arith.addf %341, %368 : vector<2x256xf32>
    %370 = vector.broadcast %151 : vector<2x1xf32> to vector<2x256xf32>
    %371 = arith.mulf %202, %370 : vector<2x256xf32>
    %372 = vector.broadcast %152 : vector<2x1xf32> to vector<2x256xf32>
    %373 = arith.mulf %209, %372 : vector<2x256xf32>
    %374 = arith.addf %371, %373 : vector<2x256xf32>
    %375 = vector.broadcast %153 : vector<2x1xf32> to vector<2x256xf32>
    %376 = arith.mulf %216, %375 : vector<2x256xf32>
    %377 = arith.addf %374, %376 : vector<2x256xf32>
    %378 = vector.broadcast %154 : vector<2x1xf32> to vector<2x256xf32>
    %379 = arith.mulf %195, %378 : vector<2x256xf32>
    %380 = arith.addf %377, %379 : vector<2x256xf32>
    %381 = vector.broadcast %155 : vector<2x1xf32> to vector<2x256xf32>
    %382 = arith.mulf %223, %381 : vector<2x256xf32>
    %383 = arith.addf %380, %382 : vector<2x256xf32>
    %384 = vector.broadcast %156 : vector<2x1xf32> to vector<2x256xf32>
    %385 = arith.mulf %230, %384 : vector<2x256xf32>
    %386 = arith.addf %383, %385 : vector<2x256xf32>
    %387 = vector.broadcast %157 : vector<2x1xf32> to vector<2x256xf32>
    %388 = arith.mulf %237, %387 : vector<2x256xf32>
    %389 = arith.addf %386, %388 : vector<2x256xf32>
    %390 = vector.extract_strided_slice %389 {offsets = [0, 32], sizes = [2, 224], strides = [1, 1]} : vector<2x256xf32> to vector<2x224xf32>
    %391 = vector.extract_strided_slice %389 {offsets = [0, 0], sizes = [2, 32], strides = [1, 1]} : vector<2x256xf32> to vector<2x32xf32>
    %392 = tpu.concatenate %390, %391 in 1 : vector<2x224xf32>, vector<2x32xf32> -> vector<2x256xf32>
    %cst_68 = arith.constant 0.000000e+00 : f32
    %393 = vector.shape_cast %103 : vector<1x256xi1> to vector<1x256xi1>
    %394 = vector.broadcast %393 : vector<1x256xi1> to vector<2x256xi1>
    %395 = vector.broadcast %cst_68 : f32 to vector<2x256xf32>
    %396 = arith.select %394, %392, %395 : vector<2x256xi1>, vector<2x256xf32>
    %397 = arith.addf %369, %396 : vector<2x256xf32>
    %398 = vector.broadcast %158 : vector<2x1xf32> to vector<2x256xf32>
    %399 = arith.mulf %202, %398 : vector<2x256xf32>
    %400 = vector.broadcast %159 : vector<2x1xf32> to vector<2x256xf32>
    %401 = arith.mulf %209, %400 : vector<2x256xf32>
    %402 = arith.addf %399, %401 : vector<2x256xf32>
    %403 = vector.broadcast %160 : vector<2x1xf32> to vector<2x256xf32>
    %404 = arith.mulf %216, %403 : vector<2x256xf32>
    %405 = arith.addf %402, %404 : vector<2x256xf32>
    %406 = vector.broadcast %161 : vector<2x1xf32> to vector<2x256xf32>
    %407 = arith.mulf %195, %406 : vector<2x256xf32>
    %408 = arith.addf %405, %407 : vector<2x256xf32>
    %409 = vector.broadcast %162 : vector<2x1xf32> to vector<2x256xf32>
    %410 = arith.mulf %223, %409 : vector<2x256xf32>
    %411 = arith.addf %408, %410 : vector<2x256xf32>
    %412 = vector.broadcast %163 : vector<2x1xf32> to vector<2x256xf32>
    %413 = arith.mulf %230, %412 : vector<2x256xf32>
    %414 = arith.addf %411, %413 : vector<2x256xf32>
    %415 = vector.broadcast %164 : vector<2x1xf32> to vector<2x256xf32>
    %416 = arith.mulf %237, %415 : vector<2x256xf32>
    %417 = arith.addf %414, %416 : vector<2x256xf32>
    %418 = vector.extract_strided_slice %417 {offsets = [0, 48], sizes = [2, 208], strides = [1, 1]} : vector<2x256xf32> to vector<2x208xf32>
    %419 = vector.extract_strided_slice %417 {offsets = [0, 0], sizes = [2, 48], strides = [1, 1]} : vector<2x256xf32> to vector<2x48xf32>
    %420 = tpu.concatenate %418, %419 in 1 : vector<2x208xf32>, vector<2x48xf32> -> vector<2x256xf32>
    %cst_69 = arith.constant 0.000000e+00 : f32
    %421 = vector.shape_cast %112 : vector<1x256xi1> to vector<1x256xi1>
    %422 = vector.broadcast %421 : vector<1x256xi1> to vector<2x256xi1>
    %423 = vector.broadcast %cst_69 : f32 to vector<2x256xf32>
    %424 = arith.select %422, %420, %423 : vector<2x256xi1>, vector<2x256xf32>
    %425 = arith.addf %397, %424 : vector<2x256xf32>
    %426 = vector.extract_strided_slice %425 {offsets = [0, 0], sizes = [1, 256], strides = [1, 1]} : vector<2x256xf32> to vector<1x256xf32>
    %427 = vector.extract_strided_slice %425 {offsets = [1, 0], sizes = [1, 256], strides = [1, 1]} : vector<2x256xf32> to vector<1x256xf32>
    %428 = arith.addf %426, %427 : vector<1x256xf32>
    %429 = vector.broadcast %165 : f32 to vector<1x256xf32>
    %430 = arith.addf %428, %429 : vector<1x256xf32>
    %431 = arith.negf %430 : vector<1x256xf32>
    %432 = math.exp %431 : vector<1x256xf32>
    %cst_70 = arith.constant 1.000000e+00 : f32
    %433 = vector.broadcast %cst_70 : f32 to vector<1x256xf32>
    %434 = arith.addf %433, %432 : vector<1x256xf32>
    %435 = arith.divf %433, %434 : vector<1x256xf32>
    %436 = vector.broadcast %435 : vector<1x256xf32> to vector<64x256xf32>
    %437 = arith.mulf %188, %436 : vector<64x256xf32>
    %c0_71 = arith.constant 0 : index
    %c0_72 = arith.constant 0 : index
    %c0_73 = arith.constant 0 : index
    %438 = vector.load %arg6[%c0_71, %c0_72, %c0_73] : memref<1x64x256xf32, #tpu.memory_space<vmem>>, vector<1x64x256xf32>
    %439 = vector.shape_cast %438 : vector<1x64x256xf32> to vector<64x256xf32>
    %440 = vector.shape_cast %437 : vector<64x256xf32> to vector<1x64x256xf32>
    tpu.vector_store %arg6[%c0_71, %c0_72, %c0_73], %440 {strides = array<i32>} : memref<1x64x256xf32, #tpu.memory_space<vmem>>, vector<1x64x256xf32>,
    return
  }
  func.func @transform_0(%arg0: i32) -> (i32, i32, i32) {
    %c0_i32 = arith.constant 0 : i32
    %c0_i32_0 = arith.constant 0 : i32
    %c0_i32_1 = arith.constant 0 : i32
    return %arg0, %c0_i32, %c0_i32_0 : i32, i32, i32
  }
  func.func @transform_1(%arg0: i32) -> (i32, i32) {
    %c0_i32 = arith.constant 0 : i32
    %c0_i32_0 = arith.constant 0 : i32
    %c0_i32_1 = arith.constant 0 : i32
    return %c0_i32, %c0_i32_0 : i32, i32
  }
  func.func @transform_2(%arg0: i32) -> (i32, i32) {
    %c0_i32 = arith.constant 0 : i32
    %c0_i32_0 = arith.constant 0 : i32
    %c0_i32_1 = arith.constant 0 : i32
    return %c0_i32, %c0_i32_0 : i32, i32
  }
  func.func @transform_3(%arg0: i32) -> (i32, i32) {
    %c0_i32 = arith.constant 0 : i32
    %c0_i32_0 = arith.constant 0 : i32
    %c0_i32_1 = arith.constant 0 : i32
    return %c0_i32, %c0_i32_0 : i32, i32
  }
  func.func @transform_4(%arg0: i32) -> i32 {
    %c0_i32 = arith.constant 0 : i32
    %c0_i32_0 = arith.constant 0 : i32
    return %c0_i32 : i32
  }
  func.func @transform_5(%arg0: i32) -> (i32, i32, i32) {
    %c0_i32 = arith.constant 0 : i32
    %c0_i32_0 = arith.constant 0 : i32
    %c0_i32_1 = arith.constant 0 : i32
    return %arg0, %c0_i32, %c0_i32_0 : i32, i32, i32
  }
}

</mosaic_0001>

<bundles_post_ra>
// kernel: tpu_custom_call.1
= control target key start
LH: loop header
LB: loop body
LE: loop exit
PB: predicated region body
PF: predicated region fallthrough
CT: control target
= control target key end

     0   :  { %s3030_s0 = inlined_call_operand.hbm [shape: f32[2,64,256], index: 0, kind: input, shape index: {}]   ;;  %s3031_s1 = inlined_call_operand.vmem [shape: f32[4,64], index: 1, kind: input, shape index: {}]   ;;  %s3032_s2 = inlined_call_operand.vmem [shape: f32[64,4], index: 2, kind: input, shape index: {}]   ;;  %s3033_s3 = inlined_call_operand.vmem [shape: f32[2,49], index: 3, kind: input, shape index: {}]   ;;  %s3034_s4 = inlined_call_operand.<no memory space> [shape: f32[1], index: 4, kind: input, shape index: {}]   ;;  %s3035_s5 = inlined_call_operand.hbm [shape: f32[2,64,256], index: 5, kind: output, shape index: {}]  }
   0x1   :  { %10 = sst [smem:[#allocation2]] %s3034_s4 }
   0x2   :  { %11 = vsyncpa [#allocation4], 0 }
   0x3   :  { %13 = vsyncpa [#allocation4 + $0x1], 0 }
   0x4   :  { %14 = vsyncpa [#allocation5], 0 }
   0x5   :  { %16 = vsyncpa [#allocation5 + $0x1], 0  ;;  %s2044_s20 = smov 0   ;;  %s2046_s21 = smov 0  }
   0x6   :  { %s2048_s22 = smov 0   ;;  %s2050_s23 = smov 0  }
   0x7 LB: > { %s2065_s4 = sadd.s32 4294967295, %s1945_s23   ;;  %s1609_s24 = sadd.s32 4294967294, %s1945_s23   ;;  %s1945_s23 = sphi %s2050_s23, %s3165_s23   ;;  %s1941_s22 = sphi %s2048_s22, %s3164_s22   ;;  %s1937_s21 = sphi %s2046_s21, %s3163_s21   ;;  %s1933_s20 = sphi %s2044_s20, %s3162_s20  }
   0x8   : > { %s2069_s25 = sadd.s32 1, %s1945_s23   ;;  %s29_s26 = sadd.s32 1, %s1941_s22 }
   0x9   : > { %s26_s27 = ssub.s32 %s1945_s23, %s2069_s25  ;;  %p36_p0 = scmp.ne.s32.totalorder %s1941_s22, %s1937_s21 }
   0xa   : > { %p27_p1 = scmp.eq.s32.totalorder %s26_s27, 0  ;;  %p37_p2 = scmp.eq.s32.totalorder %s1945_s23, 0 }
   0xb   : > { %p42_p3 = scmp.ne.s32.totalorder %s1937_s21, %s1933_s20  ;;  %p43_p4 = scmp.eq.s32.totalorder %s2065_s4, 0 }
   0xc   : > { %s2081_s28 = scalar_select %p27_p1, %s1941_s22, %s29_s26  }
   0xd   : > { %p2083_p5 = por %p37_p2, %p36_p0  ;;  %p2087_p6 = por %p43_p4, %p42_p3 }
   0xe   : > { %p150_p7 = scmp.eq.s32.totalorder %s2065_s4, 1  ;;  %p156_p8 = scmp.eq.s32.totalorder %s1609_s24, 1 }
   0xf   : > { %p1659_p10 = scmp.lt.s32.totalorder %s1945_s23, 2  ;;  %s188_s8 = sand.u32 1, %s1941_s22  }
  0x10   : > { %p2094_p11 = por %p150_p7, %p36_p0  ;;  %p2098_p12 = por %p156_p8, %p42_p3 }
  0x11   : > { %s1643_s9 = sshll.u32 %s1945_s23, 7  ;;  %s1612_s10 = sshll.u32 %s188_s8, 7 }
  0x12   : > { %s197_s13 = scalar_lea.hbm %s3030_s0, %s1643_s9  ;;  %s192_s15 = scalar_lea.vmem [#allocation3], %s1612_s10 }
  0x13   : > { %s198_s14 = sshll.u32 %s197_s13, 4  ;;  %s200_s16 = sshll.u32 %s192_s15, 4  ;;  %s199_s14 = int_to_ptr.hbm [resolvable:$true] %s198_s14  ;;  %s201_s16 = int_to_ptr.vmem [resolvable:$true] %s200_s16 }
  0x14   : > { %p2109_p13 = pnand %p1659_p10, %p2083_p5  ;;  %p1615_p0 = scmp.ge.s32.totalorder %s1945_s23, 1 }
  0x15   : > { %p208_p1 = scmp.lt.s32.totalorder %s1945_s23, 3  ;;  %s189_s18 = scalar_lea.sflag [#allocation4], %s188_s8 }
  0x16   : > { %s1849_s19 = sshra.s32 %s199_s14, 4  ;;  %p1853_p3 = pneg %p2109_p13  ;;  %s1850_s19 = int_to_ptr.hbm [resolvable:$true] %s1849_s19 }
  0x17   : > { %s1851_s24 = scalar_lea.hbm %s1850_s19, 128  ;;  %s1856_s29 = scalar_lea.hbm %s3030_s0, 256 }
  0x18   : > { %p1852_p2 = scmp.ne.s32.totalorder %s1850_s19, %s1851_s24  ;;  %p1857_p5 = scmp.lt.s32.totalorder %s1850_s19, %s3030_s0 }
  0x19   : > { %p1858_p8 = scmp.lt.s32.totalorder %s1856_s29, %s1851_s24 }
  0x1a   : > { %p1854_p4 = pnand %p1853_p3, %p1852_p2 }
  0x1b   : > { %p1859_p10 = por %p1858_p8, %p1857_p5 }
  0x1c   : > { %p1855_p7 = pneg %p1854_p4 }
  0x1e   : > { %p1860_p9 = pnand %p1859_p10, %p1855_p7 }
  0x20   : > { %1863 = shalt.err (!%p1860_p9)
}
  0x21   : > { %s1947_s8 = smov 256   ;;  %s1948_s11 = smov 16  }
  0x22   : > { %1654 = dma.hbm_to_vmem [thread:$0]  (!%p2109_p13), %s199_s14, 2048, %s201_s16, %s189_s18, %s1947_s8, %s1947_s8, %s1948_s11  }
  0x23   : > { %p209_p2 = pnand %p1615_p0, %p208_p1 }
  0x25   : > { %212 = sbr.rel (%p209_p2) target bundleno = 1248 (0x4e0), region = 40 }
  0x2a   : > { %s2130_s12 = sand.u32 1, %s1937_s21  }
  0x2b   : > { %s1616_s13 = sshll.u32 %s2130_s12, 7  ;;  %s215_s15 = scalar_lea.sflag [#allocation4], %s2130_s12 }
  0x2c   : > { %s2136_s19 = scalar_lea.vmem [#allocation3], %s1616_s13 }
  0x2d   : > { %1924 = dma.done.wait (%p2087_p6), %s215_s15, 2048  }
  0x2e   : > { %1926 = vsyncadd (%p2087_p6), %s215_s15, 4294965248  ;;  %v2143_v0 = vld [vmem:[%s2136_s19 + $0x70] sm:$0xff]  ;;  %v2146_v1 = vld [vmem:[%s2136_s19 + $0x78] sm:$0xff]  ;;  %vm432_vm0 = vcmask 7168   ;;  %vm441_vm1 = vcmask 523264   ;;  %vm491_vm2 = vcmask 1043456  }
  0x2f   : > { %v2149_v2 = vld [vmem:[%s2136_s19 + $0x60] sm:$0xff]  ;;  %v421_v3 = vadd.f32 %v2146_v1, %v2143_v0  ;;  %v2154_v4 = vld [vmem:[%s2136_s19 + $0x68] sm:$0xff]  ;;  %v2157_v5 = vld [vmem:[%s2136_s19 + $0x50] sm:$0xff]  ;;  %v397_v9 = vmax.f32 %v2143_v0, %v2146_v1  ;;  %vm466_vm3 = vcmask 31744   ;;  %s1967_s24 = smov 127   ;;  %s1995_s26 = smov 2  }
  0x30   : > { %v2160_v6 = vld [vmem:[%s2136_s19 + $0x58] sm:$0xff]  ;;  %v418_v7 = vadd.f32 %v2154_v4, %v2149_v2  ;;  %v394_v10 = vmax.f32 %v2149_v2, %v2154_v4  ;;  %v2173_v12 = vld [vmem:[%s2136_s19 + $0x40] sm:$0xff]  ;;  %v2176_v13 = vld [vmem:[%s2136_s19 + $0x48] sm:$0xff]  ;;  %s1996_s27 = smov 3   ;;  %s1998_s29 = smov 1  }
  0x31   : > { %v415_v8 = vadd.f32 %v2160_v6, %v2157_v5  ;;  %422 = vadd.xlane.f32.xlu0 %v421_v3  ;;  %v391_v11 = vmax.f32 %v2157_v5, %v2160_v6  ;;  %v2179_v14 = vld [vmem:[%s2136_s19 + $0x30] sm:$0xff]  ;;  %v2182_v15 = vld [vmem:[%s2136_s19 + $0x38] sm:$0xff]  ;;  %v412_v16 = vadd.f32 %v2176_v13, %v2173_v12  ;;  %v388_v17 = vmax.f32 %v2173_v12, %v2176_v13  ;;  %v2191_v19 = vld [vmem:[%s2136_s19 + $0x20] sm:$0xff]  ;;  %s1999_s9 = smov 126   ;;  %s2000_s10 = smov 125  }
  0x32   : > { %419 = vadd.xlane.f32.xlu1 %v418_v7  ;;  %v409_v18 = vadd.f32 %v2182_v15, %v2179_v14  ;;  %v2194_v20 = vld [vmem:[%s2136_s19 + $0x28] sm:$0xff]  ;;  %v385_v21 = vmax.f32 %v2179_v14, %v2182_v15  ;;  %v2203_v24 = vld [vmem:[%s2136_s19 + $0x10] sm:$0xff]  ;;  %v2206_v25 = vld [vmem:[%s2136_s19 + $0x18] sm:$0xff]  ;;  %s2003_s8 = smov 48   ;;  %s2004_s11 = smov 32  }
  0x33   : > { %416 = vadd.xlane.f32.xlu2 %v415_v8  ;;  %v406_v22 = vadd.f32 %v2194_v20, %v2191_v19  ;;  %v382_v23 = vmax.f32 %v2191_v19, %v2194_v20  ;;  %v2209_v26 = vld [vmem:[%s2136_s19] sm:$0xff]  ;;  %v2212_v27 = vld [vmem:[%s2136_s19 + $0x8] sm:$0xff]  ;;  %v403_v28 = vadd.f32 %v2206_v25, %v2203_v24  ;;  %v379_v29 = vmax.f32 %v2203_v24, %v2206_v25  ;;  %s2006_s15 = smov 16   ;;  %s2007_s19 = smov 112  }
  0x34   : > { %v400_v30 = vadd.f32 %v2212_v27, %v2209_v26  ;;  %v376_v31 = vmax.f32 %v2209_v26, %v2212_v27  ;;  %v349_v63 = vld [vmem:[%s3031_s1] sm:$0xf]  ;;  %v1949_v8 = vmov 2   ;;  %s2008_s16 = smov 96   ;;  %s2009_s17 = smov 80  }
  0x35   : > { %v2236_v7 = vld [vmem:[%s3033_s3] sm:$0x3]  ;;  %1758 = vset.pattern.permute.xlu1 %v1949_v8  ;;  %s359_s18 = sld [smem:[#allocation2]]  ;;  %s1899_s14 = scalar_lea.hbm %s3035_s5, 256 }
  0x39   : > { %398 = vmax.xlane.f32.xlu0 %v397_v9  ;;  %v1950_v9 = vmov 1  }
  0x3a   : > { %395 = vmax.xlane.f32.xlu1 %v394_v10  ;;  %1757 = vset.pattern.permute.xlu2 %v1950_v9  ;;  %v1951_v10 = vmov 3   ;;  %v1971_v9 = vmov 19  }
  0x3b   : > { %392 = vmax.xlane.f32.xlu2 %v391_v11  ;;  %1759 = vset.pattern.permute.xlu0 %v1951_v10  ;;  %v1952_v11 = vmov 5   ;;  %v1972_v10 = vmov 23  }
  0x41   : > { %413 = vadd.xlane.f32.xlu0 %v412_v16  ;;  %v1953_v16 = vmov 4  }
  0x42   : > { %389 = vmax.xlane.f32.xlu1 %v388_v17 }
  0x43   : > { %410 = vadd.xlane.f32.xlu2 %v409_v18 }
  0x49   : > { %386 = vmax.xlane.f32.xlu0 %v385_v21  ;;  %v350_v21 = vld [vmem:[%s3032_s2] sm:$0xff] }
  0x4a   : > { %407 = vadd.xlane.f32.xlu1 %v406_v22  ;;  %v1954_v22 = vmov 9  }
  0x4b   : > { %383 = vmax.xlane.f32.xlu2 %v382_v23  ;;  %v353_v23 = vld [vmem:[%s3032_s2 + $0x18] sm:$0xff] }
  0x51   : > { %404 = vadd.xlane.f32.xlu0 %v403_v28  ;;  %v356_v28 = vld [vmem:[%s3032_s2 + $0x30] sm:$0xff] }
  0x52   : > { %380 = vmax.xlane.f32.xlu1 %v379_v29  ;;  %v1955_v29 = vmov 8  }
  0x53   : > { %401 = vadd.xlane.f32.xlu2 %v400_v30  ;;  %v1956_v30 = vmov 6  }
  0x59   : > { %377 = vmax.xlane.f32.xlu0 %v376_v31  ;;  %v351_v31 = vld [vmem:[%s3032_s2 + $0x8] sm:$0xff] }
  0x6b   : > { %954 = vperm.xlu1 %1758, %v2236_v7   ;;  %946 = vperm.xlu2 %1757, %v2236_v7  }
  0x6d   : > { %962 = vperm.xlu0 %1759, %v2236_v7  }
  0x73   : > { %1761 = vset.pattern.permute.xlu1 %v1952_v11  ;;  %1760 = vset.pattern.permute.xlu2 %v1953_v16  ;;  %v1973_v11 = vmov 26  }
  0x74   : > { %978 = vperm.xlu1 %1761, %v2236_v7   ;;  %970 = vperm.xlu2 %1760, %v2236_v7  }
  0x75   : > { %1765 = vset.pattern.permute.xlu0 %v1954_v22  ;;  %v1975_v22 = vmov 0  }
  0x76   : > { %1026 = vperm.xlu0 %1765, %v2236_v7  }
  0x7c   : > { %1764 = vset.pattern.permute.xlu1 %v1955_v29  ;;  %1762 = vset.pattern.permute.xlu2 %v1956_v30 }
  0x7d   : > { %1018 = vperm.xlu1 %1764, %v2236_v7   ;;  %986 = vperm.xlu2 %1762, %v2236_v7  }
  0xa4   : > { %v423_v32 = vpop.xlane.xlu0 %422 }
  0xa5   : > { %v420_v33 = vpop.xlane.xlu1 %419  ;;  %v431_v35 = vmul.f32 0.00390625, %v423_v32  ;;  %v354_v32 = vld [vmem:[%s3032_s2 + $0x20] sm:$0xff] }
  0xa6   : > { %v417_v34 = vpop.xlane.xlu2 %416  ;;  %v430_v36 = vmul.f32 0.00390625, %v420_v33  ;;  %v357_v33 = vld [vmem:[%s3032_s2 + $0x38] sm:$0xff] }
  0xa7   : > { %v429_v38 = vmul.f32 0.00390625, %v417_v34  ;;  %v1957_v34 = vmov 15  }
  0xa8   : > { %1771 = vset.pattern.permute.xlu0 %v1957_v34  ;;  %v1978_v34 = vmov 31  }
  0xa9   : > { %1092 = vperm.xlu0 %1771, %v2236_v7  }
  0xac   : > { %v399_v37 = vpop.xlane.xlu0 %398 }
  0xad   : > { %v396_v39 = vpop.xlane.xlu1 %395  ;;  %v440_v41 = vsel %vm432_vm0, %v399_v37, %v431_v35  ;;  %v352_v35 = vld [vmem:[%s3032_s2 + $0x10] sm:$0xff]  ;;  %v1959_v37 = vmov 7  }
  0xae   : > { %v393_v40 = vpop.xlane.xlu2 %392  ;;  %453 = vmatpush.msra.mxu0 %v440_v41  ;;  %v439_v42 = vsel %vm432_vm0, %v396_v39, %v430_v36  ;;  %v1958_v36 = vmov 11   ;;  %1763 = vset.pattern.permute.xlu2 %v1959_v37  ;;  %v1960_v39 = vmov 13   ;;  %v1962_v41 = vmov 14  }
  0xaf   : > { %v438_v43 = vsel %vm432_vm0, %v393_v40, %v429_v38  ;;  %1767 = vset.pattern.permute.xlu1 %v1958_v36  ;;  %v355_v38 = vld [vmem:[%s3032_s2 + $0x28] sm:$0xff]  ;;  %1012 = vperm.xlu2 %1763, %v2236_v7   ;;  %v1961_v40 = vmov 10  }
  0xb0   : > { %454 = vmatpush.msra.mxu0 %v439_v42  ;;  %1042 = vperm.xlu1 %1767, %v2236_v7   ;;  %v1963_v42 = vmov 12  }
  0xb2   : > { %455 = vmatpush.msra.mxu0 %v438_v43  ;;  %v1964_v43 = vmov 20  }
  0xb3   : > { %1776 = vset.pattern.permute.xlu0 %v1964_v43 }
  0xb4   : > { %v414_v44 = vpop.xlane.xlu0 %413  ;;  %1132 = vperm.xlu0 %1776, %v2236_v7  }
  0xb5   : > { %v428_v45 = vmul.f32 0.00390625, %v414_v44  ;;  %v390_v46 = vpop.xlane.xlu1 %389  ;;  %v1965_v44 = vmov 17  }
  0xb6   : > { %v411_v47 = vpop.xlane.xlu2 %410 }
  0xb7   : > { %v437_v48 = vsel %vm432_vm0, %v390_v46, %v428_v45  ;;  %v427_v49 = vmul.f32 0.00390625, %v411_v47  ;;  %1766 = vset.pattern.permute.xlu2 %v1961_v40  ;;  %v1966_v45 = vmov 16  }
  0xb8   : > { %456 = vmatpush.msra.mxu0 %v437_v48  ;;  %1769 = vset.pattern.permute.xlu1 %v1960_v39 }
  0xb9   : > { %1058 = vperm.xlu1 %1769, %v2236_v7   ;;  %1034 = vperm.xlu2 %1766, %v2236_v7  }
  0xbc   : > { %v387_v50 = vpop.xlane.xlu0 %386  ;;  %1779 = vset.pattern.permute.xlu0 %v1972_v10 }
  0xbd   : > { %v436_v51 = vsel %vm432_vm0, %v387_v50, %v427_v49  ;;  %v408_v52 = vpop.xlane.xlu1 %407 }
  0xbe   : > { %v384_v53 = vpop.xlane.xlu2 %383  ;;  %457 = vmatpush.msra.mxu0 %v436_v51  ;;  %v426_v54 = vmul.f32 0.00390625, %v408_v52 }
  0xc0   : > { %v435_v55 = vsel %vm432_vm0, %v384_v53, %v426_v54 }
  0xc1   : > { %458 = vmatpush.msra.mxu0 %v435_v55  ;;  %1770 = vset.pattern.permute.xlu1 %v1962_v41  ;;  %v1968_v55 = vmov 18  }
  0xc2   : > { %1768 = vset.pattern.permute.xlu2 %v1963_v42  ;;  %1086 = vperm.xlu1 %1770, %v2236_v7   ;;  %v1979_v42 = vmov 27  }
  0xc3   : > { %1050 = vperm.xlu2 %1768, %v2236_v7  }
  0xc4   : > { %v405_v56 = vpop.xlane.xlu0 %404 }
  0xc5   : > { %v425_v57 = vmul.f32 0.00390625, %v405_v56  ;;  %v381_v58 = vpop.xlane.xlu1 %380 }
  0xc6   : > { %v402_v59 = vpop.xlane.xlu2 %401 }
  0xc7   : > { %v434_v60 = vsel %vm432_vm0, %v381_v58, %v425_v57  ;;  %v424_v61 = vmul.f32 0.00390625, %v402_v59 }
  0xc8   : > { %459 = vmatpush.msra.mxu0 %v434_v60 }
  0xca   : > { %1773 = vset.pattern.permute.xlu1 %v1965_v44 }
  0xcb   : > { %1772 = vset.pattern.permute.xlu2 %v1966_v45 }
  0xcc   : > { %v378_v62 = vpop.xlane.xlu0 %377 }
  0xcd   : > { %v433_v3 = vsel %vm432_vm0, %v378_v62, %v424_v61  ;;  %v1969_v61 = vmov 21  }
  0xce   : > { %460 = vmatpush.msra.mxu0 %v433_v3  ;;  %v2317_v54 = vpop.permute.xlu2 %946  ;;  %v1970_v3 = vmov 24  }
  0xcf   : > { %1618 = vmatmul.msk.f32.vlgmr.msra.gmra.mxu0 %vm441_vm1, %v349_v63 }
  0xd6   : > { %v2320_v56 = vpop.permute.xlu2 %970 }
  0xdd   : > { %v2322_v57 = vpop.permute.xlu1 %954 }
  0xde   : > { %v2324_v58 = vpop.permute.xlu2 %986 }
  0xe6   : > { %v2326_v59 = vpop.permute.xlu1 %978 }
  0xef   : > { %v2331_v62 = vpop.permute.xlu1 %1018 }
 0x109   : > { %v2328_v60 = vpop.permute.xlu2 %1012 }
 0x113   : > { %v2333_v63 = vpop.permute.xlu2 %1034 }
 0x11d   : > { %v2339_v16 = vpop.permute.xlu2 %1050 }
 0x122   : > { %v2336_v8 = vpop.permute.xlu1 %1042 }
 0x14c   : > { %v462_v17 = vpop.f32.mrf.mxu0 }
 0x14d   : > { %v465_v18 = vmax.f32 %v462_v17, 0.0  ;;  %v2343_v17 = vpop.permute.xlu0 %962 }
 0x14f   : > { %1619 = vmatpush.msk.msra.mxu1 %vm491_vm2, %v465_v18  ;;  %1645 = vmatpush.msk.msra.mxu2 %vm491_vm2, %v465_v18 }
 0x150   : > { %1646 = vmatpush.msk.msra.mxu3 %vm491_vm2, %v465_v18  ;;  %1620 = vmatmul.msk.f32.vlgmr.msra.gmra.mxu1 %vm466_vm3, %v350_v21  ;;  %v1974_v18 = vmov 22   ;;  %v2345_v21 = vpop.permute.xlu1 %1058 }
 0x151   : > { %1623 = vmatmul.msk.f32.vlgmr.msra.gmra.mxu2 %vm466_vm3, %v353_v23  ;;  %1626 = vmatmul.msk.f32.vlgmr.msra.gmra.mxu3 %vm466_vm3, %v356_v28  ;;  %v1976_v23 = vmov 28  }
 0x158   : > { %1621 = vmatmul.msk.f32.gmra.mxu1 %vm466_vm3, %v351_v31  ;;  %v2350_v31 = vpop.permute.xlu0 %1026 }
 0x159   : > { %1624 = vmatmul.msk.f32.gmra.mxu2 %vm466_vm3, %v354_v32  ;;  %1627 = vmatmul.msk.f32.gmra.mxu3 %vm466_vm3, %v357_v33  ;;  %v1977_v32 = vmov 25   ;;  %v2353_v33 = vpop.permute.xlu1 %1086 }
 0x160   : > { %1622 = vmatmul.msk.f32.gmra.mxu1 %vm466_vm3, %v352_v35  ;;  %v2357_v40 = vpop.permute.xlu0 %1092 }
 0x161   : > { %1625 = vmatmul.msk.f32.gmra.mxu2 %vm466_vm3, %v355_v38 }
 0x168   : > { %v2363_v10 = vpop.permute.xlu0 %1132 }
 0x1cd   : > { %v2286_v46 = vpop.f32.mrf.mxu1 }
 0x1ce   : > { %544 = vrot.lane.b32.xlu1 %v2286_v46, %s1967_s24 }
 0x1d4   : > { %v521_v47 = vpop.f32.mrf.mxu2  ;;  %v2294_v49 = vpop.f32.mrf.mxu3 }
 0x1d5   : > { %550 = vrot.lane.b32.xlu2 %v521_v47, %s1967_s24  ;;  %v2291_v48 = vpop.f32.mrf.mxu1 }
 0x1d6   : > { %1108 = vperm.xlu1 %1773, %v2236_v7  }
 0x1dc   : > { %v2296_v50 = vpop.f32.mrf.mxu2  ;;  %v2306_v52 = vpop.f32.mrf.mxu3 }
 0x1dd   : > { %556 = vrot.lane.b32.xlu2 %v2294_v49, %s1967_s24  ;;  %v2300_v51 = vpop.f32.mrf.mxu1 }
 0x1de   : > { %552 = vrot.lane.b32.xlu1 %v2296_v50, %s1967_s24  ;;  %548 = vrot.lane.b32.xlu0 %v2300_v51, %s1967_s24 }
 0x1df   : > { %1775 = vset.pattern.permute.xlu1 %v1971_v9 }
 0x1e4   : > { %v2308_v53 = vpop.f32.mrf.mxu2 }
 0x1e5   : > { %546 = vrot.lane.b32.xlu2 %v2291_v48, %s1967_s24 }
 0x1e6   : > { %558 = vrot.lane.b32.xlu1 %v2306_v52, %s1967_s24  ;;  %554 = vrot.lane.b32.xlu0 %v2308_v53, %s1967_s24 }
 0x1ed   : > { %1100 = vperm.xlu2 %1772, %v2236_v7  }
 0x1ee   : > { %1124 = vperm.xlu1 %1775, %v2236_v7   ;;  %1174 = vperm.xlu0 %1779, %v2236_v7  }
 0x1f5   : > { %1774 = vset.pattern.permute.xlu2 %v1968_v55 }
 0x1f6   : > { %1116 = vperm.xlu2 %1774, %v2236_v7   ;;  %1778 = vset.pattern.permute.xlu1 %v1974_v18 }
 0x1f7   : > { %1166 = vperm.xlu1 %1778, %v2236_v7   ;;  %1784 = vset.pattern.permute.xlu0 %v1976_v23 }
 0x1f8   : > { %1216 = vperm.xlu0 %1784, %v2236_v7  }
 0x1fe   : > { %1777 = vset.pattern.permute.xlu2 %v1969_v61 }
 0x1ff   : > { %1160 = vperm.xlu2 %1777, %v2236_v7   ;;  %1781 = vset.pattern.permute.xlu1 %v1977_v32 }
 0x200   : > { %1190 = vperm.xlu1 %1781, %v2236_v7   ;;  %1791 = vset.pattern.permute.xlu0 %v1978_v34 }
 0x201   : > { %1238 = vperm.xlu0 %1791, %v2236_v7  }
 0x207   : > { %1780 = vset.pattern.permute.xlu2 %v1970_v3 }
 0x208   : > { %1182 = vperm.xlu2 %1780, %v2236_v7   ;;  %1783 = vset.pattern.permute.xlu1 %v1979_v42 }
 0x209   : > { %1792 = vset.pattern.permute.xlu0 %v1975_v22  ;;  %1206 = vperm.xlu1 %1783, %v2236_v7  }
 0x210   : > { %1782 = vset.pattern.permute.xlu2 %v1973_v11 }
 0x211   : > { %1198 = vperm.xlu2 %1782, %v2236_v7  }
 0x219   : > { %1785 = vset.pattern.permute.xlu2 %v1975_v22 }
 0x22f   : > { %v551_v28 = vpop.permute.xlu2 %550 }
 0x230   : > { %v571_v29 = vadd.f32 %v551_v28, %v521_v47 }
 0x232   : > { %v1631_v30 = vmul.f32 -1.442695, %v571_v29  ;;  %v1980_v29 = vmov 30  }
 0x233   : > { %1787 = vset.pattern.permute.xlu1 %v1980_v29 }
 0x234   : > { %1808 = vpow2.f32 %v1631_v30  ;;  %1230 = vperm.xlu1 %1787, %v2236_v7  }
 0x237   : > { %v557_v35 = vpop.permute.xlu2 %556 }
 0x238   : > { %v574_v36 = vadd.f32 %v557_v35, %v2294_v49 }
 0x23a   : > { %v1809_v37 = vpop.eup %1808  ;;  %v1634_v38 = vmul.f32 -1.442695, %v574_v36 }
 0x23b   : > { %v603_v39 = vadd.f32 1.0, %v1809_v37 }
 0x23c   : > { %1810 = vpow2.f32 %v1634_v38  ;;  %1789 = vset.pattern.permute.xlu1 %v1975_v22 }
 0x23d   : > { %1812 = vrcp.f32 %v603_v39  ;;  %v664_v18 = vand.u32 2147483648, %v603_v39  ;;  %v662_v28 = vand.u32 2147483647, %v603_v39  ;;  %vm658_vm5 = vweird.f32 %v603_v39 }
 0x23f   : > { %v547_v41 = vpop.permute.xlu2 %546  ;;  %v665_v35 = vor.u32 1.1754944e-38, %v664_v18  ;;  %vm663_vm7 = vcmp.eq.f32.partialorder %v662_v28, 8.507059e+37 }
 0x240   : > { %v569_v43 = vadd.f32 %v547_v41, %v2291_v48  ;;  %v545_v44 = vpop.permute.xlu1 %544 }
 0x241   : > { %v568_v45 = vadd.f32 %v545_v44, %v2286_v46 }
 0x242   : > { %v1811_v47 = vpop.eup %1810  ;;  %v1629_v49 = vmul.f32 -1.442695, %v569_v43 }
 0x243   : > { %v1813_v55 = vpop.eup %1812  ;;  %v606_v61 = vadd.f32 1.0, %v1811_v47  ;;  %v1628_v3 = vmul.f32 -1.442695, %v568_v45 }
 0x244   : > { %1814 = vpow2.f32 %v1629_v49  ;;  %v654_v9 = vmul.f32 %v1813_v55, %v603_v39  ;;  %vm659_vm4 = vweird.f32 %v1813_v55 }
 0x245   : > { %1816 = vrcp.f32 %v606_v61  ;;  %vm660_vm6 = vmor %vm658_vm5, %vm659_vm4  ;;  %v709_v44 = vand.u32 2147483648, %v606_v61  ;;  %v707_v49 = vand.u32 2147483647, %v606_v61  ;;  %vm703_vm9 = vweird.f32 %v606_v61 }
 0x246   : > { %1818 = vpow2.f32 %v1628_v3  ;;  %v655_v11 = vsub.f32 1.0, %v654_v9 }
 0x247   : > { %v710_v28 = vor.u32 1.1754944e-38, %v709_v44  ;;  %vm708_vm11 = vcmp.eq.f32.partialorder %v707_v49, 8.507059e+37 }
 0x248   : > { %v2365_v23 = vpop.permute.xlu1 %1108  ;;  %v656_v48 = vmul.f32 %v1813_v55, %v655_v11 }
 0x24a   : > { %v1815_v46 = vpop.eup %1814  ;;  %v657_v30 = vadd.f32 %v1813_v55, %v656_v48 }
 0x24b   : > { %v1817_v32 = vpop.eup %1816  ;;  %v601_v34 = vadd.f32 1.0, %v1815_v46 }
 0x24c   : > { %v1819_v36 = vpop.eup %1818  ;;  %v661_v37 = vsel %vm660_vm6, %v1813_v55, %v657_v30  ;;  %v699_v38 = vmul.f32 %v1817_v32, %v606_v61  ;;  %vm704_vm8 = vweird.f32 %v1817_v32 }
 0x24d   : > { %1820 = vrcp.f32 %v601_v34  ;;  %v2368_v41 = vadd.f32 1.0, %v1819_v36  ;;  %v666_v42 = vsel %vm663_vm7, %v665_v35, %v661_v37  ;;  %vm705_vm10 = vmor %vm703_vm9, %vm704_vm8  ;;  %v632_v36 = vand.u32 2147483647, %v601_v34 }
 0x24e   : > { %745 = vperm.xlu2 %1785, %v666_v42   ;;  %v700_v43 = vsub.f32 1.0, %v699_v38  ;;  %v634_v22 = vand.u32 2147483648, %v601_v34  ;;  %vm628_vm13 = vweird.f32 %v601_v34 }
 0x24f   : > { %1822 = vrcp.f32 %v2368_v41  ;;  %v619_v44 = vand.u32 2147483648, %v2368_v41  ;;  %vm633_vm1 = vcmp.eq.f32.partialorder %v632_v36, 8.507059e+37  ;;  %vm613_vm2 = vweird.f32 %v2368_v41 }
 0x250   : > { %v553_v45 = vpop.permute.xlu1 %552  ;;  %v549_v47 = vpop.permute.xlu0 %548  ;;  %v701_v39 = vmul.f32 %v1817_v32, %v700_v43 }
 0x251   : > { %v572_v3 = vadd.f32 %v553_v45, %v2296_v50  ;;  %v570_v55 = vadd.f32 %v549_v47, %v2300_v51 }
 0x252   : > { %v702_v9 = vadd.f32 %v1817_v32, %v701_v39  ;;  %v617_v39 = vand.u32 2147483647, %v2368_v41 }
 0x253   : > { %v1821_v11 = vpop.eup %1820  ;;  %v1632_v18 = vmul.f32 -1.442695, %v572_v3  ;;  %v1630_v48 = vmul.f32 -1.442695, %v570_v55  ;;  %v635_v55 = vor.u32 1.1754944e-38, %v634_v22 }
 0x254   : > { %v706_v29 = vsel %vm705_vm10, %v1817_v32, %v702_v9  ;;  %v624_v46 = vmul.f32 %v1821_v11, %v601_v34  ;;  %vm629_vm12 = vweird.f32 %v1821_v11  ;;  %vm618_vm4 = vcmp.eq.f32.partialorder %v617_v39, 8.507059e+37 }
 0x255   : > { %v1823_v30 = vpop.eup %1822  ;;  %1824 = vpow2.f32 %v1632_v18  ;;  %v711_v35 = vsel %vm708_vm11, %v710_v28, %v706_v29  ;;  %vm630_vm15 = vmor %vm628_vm13, %vm629_vm12  ;;  %v620_v28 = vor.u32 1.1754944e-38, %v619_v44 }
 0x256   : > { %1826 = vpow2.f32 %v1630_v48  ;;  %760 = vperm.xlu2 %1785, %v711_v35   ;;  %v625_v50 = vsub.f32 1.0, %v624_v46  ;;  %v609_v51 = vmul.f32 %v1823_v30, %v2368_v41  ;;  %vm614_vm14 = vweird.f32 %v1823_v30 }
 0x257   : > { %vm615_vm3 = vmor %vm613_vm2, %vm614_vm14 }
 0x258   : > { %v559_v37 = vpop.permute.xlu1 %558  ;;  %v555_v61 = vpop.permute.xlu0 %554  ;;  %v626_v38 = vmul.f32 %v1821_v11, %v625_v50  ;;  %v610_v42 = vsub.f32 1.0, %v609_v51 }
 0x259   : > { %v575_v43 = vadd.f32 %v559_v37, %v2306_v52  ;;  %v573_v32 = vadd.f32 %v555_v61, %v2308_v53 }
 0x25a   : > { %v627_v45 = vadd.f32 %v1821_v11, %v626_v38  ;;  %v611_v47 = vmul.f32 %v1823_v30, %v610_v42 }
 0x25b   : > { %v1825_v49 = vpop.eup %1824  ;;  %v1635_v3 = vmul.f32 -1.442695, %v575_v43  ;;  %v1633_v52 = vmul.f32 -1.442695, %v573_v32 }
 0x25c   : > { %v1827_v9 = vpop.eup %1826  ;;  %v604_v18 = vadd.f32 1.0, %v1825_v49  ;;  %v631_v48 = vsel %vm630_vm15, %v1821_v11, %v627_v45  ;;  %v612_v53 = vadd.f32 %v1823_v30, %v611_v47 }
 0x25d   : > { %1828 = vpow2.f32 %v1635_v3  ;;  %v636_v34 = vsel %vm633_vm1, %v635_v55, %v631_v48  ;;  %v2381_v29 = vadd.f32 1.0, %v1827_v9 }
 0x25e   : > { %1830 = vrcp.f32 %v604_v18  ;;  %735 = vperm.xlu2 %1785, %v636_v34   ;;  %v616_v46 = vsel %vm615_vm3, %v1823_v30, %v612_v53  ;;  %v679_v38 = vand.u32 2147483648, %v604_v18  ;;  %v677_v42 = vand.u32 2147483647, %v604_v18 }
 0x25f   : > { %v621_v35 = vsel %vm618_vm4, %v620_v28, %v616_v46  ;;  %1832 = vpow2.f32 %v1633_v52  ;;  %vm673_vm6 = vweird.f32 %v604_v18  ;;  %vm643_vm3 = vweird.f32 %v2381_v29 }
 0x260   : > { %730 = vperm.xlu0 %1792, %v621_v35   ;;  %1834 = vrcp.f32 %v2381_v29  ;;  %v680_v45 = vor.u32 1.1754944e-38, %v679_v38  ;;  %vm678_vm8 = vcmp.eq.f32.partialorder %v677_v42, 8.507059e+37 }
 0x263   : > { %v1829_v41 = vpop.eup %1828 }
 0x264   : > { %v1831_v50 = vpop.eup %1830  ;;  %v607_v11 = vadd.f32 1.0, %v1829_v41 }
 0x265   : > { %v669_v51 = vmul.f32 %v1831_v50, %v604_v18  ;;  %v1833_v36 = vpop.eup %1832  ;;  %vm674_vm5 = vweird.f32 %v1831_v50 }
 0x266   : > { %1836 = vrcp.f32 %v607_v11  ;;  %v605_v22 = vadd.f32 1.0, %v1833_v36  ;;  %v1835_v61 = vpop.eup %1834  ;;  %vm675_vm7 = vmor %vm673_vm6, %vm674_vm5  ;;  %v724_v52 = vand.u32 2147483648, %v607_v11  ;;  %v722_v34 = vand.u32 2147483647, %v607_v11 }
 0x267   : > { %v670_v37 = vsub.f32 1.0, %v669_v51  ;;  %v639_v32 = vmul.f32 %v1835_v61, %v2381_v29  ;;  %vm718_vm10 = vweird.f32 %v607_v11  ;;  %vm644_vm1 = vweird.f32 %v1835_v61 }
 0x268   : > { %940 = vperm.xlu0 %1792, %v2236_v7   ;;  %1838 = vrcp.f32 %v605_v22  ;;  %v694_v46 = vand.u32 2147483648, %v605_v22  ;;  %v725_v41 = vor.u32 1.1754944e-38, %v724_v52  ;;  %v692_v51 = vand.u32 2147483647, %v605_v22  ;;  %vm645_vm4 = vmor %vm643_vm3, %vm644_vm1 }
 0x269   : > { %v671_v30 = vmul.f32 %v1831_v50, %v670_v37  ;;  %v640_v9 = vsub.f32 1.0, %v639_v32  ;;  %vm723_vm13 = vcmp.eq.f32.partialorder %v722_v34, 8.507059e+37  ;;  %vm688_vm14 = vweird.f32 %v605_v22 }
 0x26a   : > { %vm693_vm2 = vcmp.eq.f32.partialorder %v692_v51, 8.507059e+37  ;;  %vm838_vm6 = vcmask 1040384   ;;  %vm910_vm3 = vcmask 1031168  }
 0x26b   : > { %v672_v43 = vadd.f32 %v1831_v50, %v671_v30  ;;  %v641_v35 = vmul.f32 %v1835_v61, %v640_v9  ;;  %v695_v30 = vor.u32 1.1754944e-38, %v694_v46  ;;  %v1986_v9 = vmov 45  }
 0x26c   : > { %v1837_v44 = vpop.eup %1836 }
 0x26d   : > { %v676_v47 = vsel %vm675_vm7, %v1831_v50, %v672_v43  ;;  %v714_v39 = vmul.f32 %v1837_v44, %v607_v11  ;;  %vm719_vm9 = vweird.f32 %v1837_v44  ;;  %v642_v42 = vadd.f32 %v1835_v61, %v641_v35 }
 0x26e   : > { %v681_v49 = vsel %vm678_vm8, %v680_v45, %v676_v47  ;;  %v1839_v3 = vpop.eup %1838  ;;  %vm720_vm11 = vmor %vm718_vm10, %vm719_vm9  ;;  %v649_v11 = vand.u32 2147483648, %v2381_v29  ;;  %v647_v45 = vand.u32 2147483647, %v2381_v29  ;;  %v1984_v29 = vmov 32  }
 0x26f   : > { %750 = vperm.xlu1 %1789, %v681_v49   ;;  %v715_v55 = vsub.f32 1.0, %v714_v39  ;;  %v684_v48 = vmul.f32 %v1839_v3, %v605_v22  ;;  %vm689_vm12 = vweird.f32 %v1839_v3  ;;  %v1981_v39 = vmov 38  }
 0x270   : > { %vm690_vm15 = vmor %vm688_vm14, %vm689_vm12  ;;  %v650_v47 = vor.u32 1.1754944e-38, %v649_v11  ;;  %vm648_vm5 = vcmp.eq.f32.partialorder %v647_v45, 8.507059e+37  ;;  %v1982_v49 = vmov 36   ;;  %vm848_vm7 = vcmask 23552  }
 0x271   : > { %v716_v53 = vmul.f32 %v1837_v44, %v715_v55  ;;  %v685_v28 = vsub.f32 1.0, %v684_v48  ;;  %v2394_v55 = vpop.permute.xlu2 %1100  ;;  %v2399_v48 = vpop.permute.xlu1 %1124 }
 0x273   : > { %v717_v18 = vadd.f32 %v1837_v44, %v716_v53  ;;  %v686_v50 = vmul.f32 %v1839_v3, %v685_v28  ;;  %v1987_v53 = vmov 29  }
 0x274   : > { %1786 = vset.pattern.permute.xlu2 %v1987_v53 }
 0x275   : > { %v721_v36 = vsel %vm720_vm11, %v1837_v44, %v717_v18  ;;  %v687_v38 = vadd.f32 %v1839_v3, %v686_v50  ;;  %v646_v44 = vsel %vm645_vm4, %v1835_v61, %v642_v42  ;;  %v1985_v61 = vmov 33   ;;  %1222 = vperm.xlu2 %1786, %v2236_v7   ;;  %v2406_v18 = vpop.permute.xlu0 %1174 }
 0x276   : > { %v726_v37 = vsel %vm723_vm13, %v725_v41, %v721_v36  ;;  %v651_v22 = vsel %vm648_vm5, %v650_v47, %v646_v44  ;;  %v1988_v41 = vmov 35   ;;  %v1991_v44 = vmov 44  }
 0x277   : > { %765 = vperm.xlu1 %1789, %v726_v37   ;;  %v691_v43 = vsel %vm690_vm15, %v1839_v3, %v687_v38  ;;  %v1983_v3 = vmov 42   ;;  %v1989_v37 = vmov 37   ;;  %vm864_vm11 = vcmask 15360  }
 0x278   : > { %v696_v32 = vsel %vm693_vm2, %v695_v30, %v691_v43  ;;  %v1990_v43 = vmov 43   ;;  %vm894_vm15 = vcmask 1039360  }
 0x279   : > { %755 = vperm.xlu0 %1792, %v696_v32   ;;  %v2397_v52 = vpop.permute.xlu2 %1116  ;;  %v2404_v28 = vpop.permute.xlu1 %1166 }
 0x27d   : > { %1788 = vset.pattern.permute.xlu2 %v1988_v41  ;;  %v2413_v50 = vpop.permute.xlu0 %1216 }
 0x27e   : > { %1290 = vperm.xlu2 %1788, %v2236_v7  }
 0x27f   : > { %740 = vperm.xlu1 %1789, %v651_v22  }
 0x281   : > { %1797 = vset.pattern.permute.xlu0 %v1981_v39  ;;  %v2402_v34 = vpop.permute.xlu2 %1160  ;;  %v2410_v35 = vpop.permute.xlu1 %1190 }
 0x282   : > { %1312 = vperm.xlu0 %1797, %v2236_v7   ;;  %3066 = vst [vmem:[#allocation9_spill] sm:$0xff] %v2410_v35 }
 0x285   : > { %v2419_v38 = vpop.permute.xlu0 %1238 }
 0x286   : > { %1793 = vset.pattern.permute.xlu2 %v1989_v37 }
 0x287   : > { %1790 = vset.pattern.permute.xlu1 %v1982_v49  ;;  %1304 = vperm.xlu2 %1793, %v2236_v7   ;;  %v1992_v49 = vmov 39  }
 0x288   : > { %1296 = vperm.xlu1 %1790, %v2236_v7  }
 0x289   : > { %v2408_v46 = vpop.permute.xlu2 %1182  ;;  %v2417_v36 = vpop.permute.xlu1 %1206 }
 0x28a   : > { %3068 = vst [vmem:[#allocation11_spill] sm:$0xff] %v2417_v36 }
 0x28f   : > { %1795 = vset.pattern.permute.xlu2 %v1990_v43 }
 0x290   : > { %1794 = vset.pattern.permute.xlu1 %v1983_v3  ;;  %1370 = vperm.xlu2 %1795, %v2236_v7   ;;  %v1993_v3 = vmov 34  }
 0x291   : > { %1364 = vperm.xlu1 %1794, %v2236_v7   ;;  %v2415_v51 = vpop.permute.xlu2 %1198  ;;  %1802 = vset.pattern.permute.xlu0 %v1993_v3 }
 0x292   : > { %3067 = vst [vmem:[#allocation10_spill] sm:$0xff] %v2415_v51  ;;  %1262 = vperm.xlu0 %1802, %v2236_v7  }
 0x298   : > { %1798 = vset.pattern.permute.xlu2 %v1991_v44 }
 0x299   : > { %1796 = vset.pattern.permute.xlu1 %v1984_v29  ;;  %1378 = vperm.xlu2 %1798, %v2236_v7  }
 0x29a   : > { %1246 = vperm.xlu1 %1796, %v2236_v7  }
 0x2a1   : > { %1800 = vset.pattern.permute.xlu2 %v1992_v49 }
 0x2a2   : > { %1799 = vset.pattern.permute.xlu1 %v1985_v61  ;;  %1320 = vperm.xlu2 %1800, %v2236_v7  }
 0x2a3   : > { %1254 = vperm.xlu1 %1799, %v2236_v7  }
 0x2a6   : > { %v2422_v42 = vpop.permute.xlu1 %1230 }
 0x2a7   : > { %3069 = vst [vmem:[#allocation12_spill] sm:$0xff] %v2422_v42 }
 0x2a8   : > { %v746_v30 = vpop.permute.xlu2 %745 }
 0x2a9   : > { %v2443_v37 = vmul.f32 %v746_v30, %v2179_v14  ;;  %v2446_v43 = vmul.f32 %v746_v30, %v2182_v15 }
 0x2ab   : > { %1801 = vset.pattern.permute.xlu1 %v1986_v9  ;;  %3074 = vst [vmem:[#allocation17_spill] sm:$0xff] %v2443_v37 }
 0x2ac   : > { %1386 = vperm.xlu1 %1801, %v2236_v7   ;;  %3075 = vst [vmem:[#allocation18_spill] sm:$0xff] %v2446_v43 }
 0x2b0   : > { %v761_v32 = vpop.permute.xlu2 %760 }
 0x2b8   : > { %v736_v39 = vpop.permute.xlu2 %735 }
 0x2b9   : > { %v2431_v61 = vmul.f32 %v736_v39, %v2203_v24  ;;  %v2434_v9 = vmul.f32 %v736_v39, %v2206_v25 }
 0x2bb   : > { %3070 = vst [vmem:[#allocation13_spill] sm:$0xff] %v2431_v61  ;;  %v785_v25 = vmax.f32 %v2431_v61, %v2443_v37 }
 0x2bc   : > { %3071 = vst [vmem:[#allocation14_spill] sm:$0xff] %v2434_v9 }
 0x2d2   : > { %v731_v11 = vpop.permute.xlu0 %730 }
 0x2d3   : > { %v2437_v53 = vmul.f32 %v731_v11, %v2209_v26  ;;  %v2440_v41 = vmul.f32 %v731_v11, %v2212_v27  ;;  %v798_v26 = vmax.f32 %v2434_v9, %v2446_v43 }
 0x2d5   : > { %3072 = vst [vmem:[#allocation15_spill] sm:$0xff] %v2437_v53  ;;  %v810_v14 = vadd.f32 %v2431_v61, %v2437_v53  ;;  %v823_v15 = vadd.f32 %v2434_v9, %v2440_v41 }
 0x2d6   : > { %3073 = vst [vmem:[#allocation16_spill] sm:$0xff] %v2440_v41 }
 0x2da   : > { %v2425_v47 = vpop.permute.xlu0 %940 }
 0x2e1   : > { %v751_v45 = vpop.permute.xlu1 %750 }
 0x2e2   : > { %v2472_v11 = vmul.f32 %v751_v45, %v2176_v13  ;;  %v2486_v13 = vmul.f32 %v761_v32, %v2154_v4 }
 0x2e4   : > { %3081 = vst [vmem:[#allocation24_spill] sm:$0xff] %v2472_v11 }
 0x2e5   : > { %3083 = vst [vmem:[#allocation26_spill] sm:$0xff] %v2486_v13 }
 0x2e9   : > { %v766_v22 = vpop.permute.xlu1 %765 }
 0x2eb   : > { %v756_v29 = vpop.permute.xlu0 %755 }
 0x2ec   : > { %v2449_v44 = vmul.f32 %v756_v29, %v2157_v5  ;;  %v2452_v24 = vmul.f32 %v756_v29, %v2160_v6  ;;  %v2469_v6 = vmul.f32 %v751_v45, %v2173_v12  ;;  %v2483_v12 = vmul.f32 %v761_v32, %v2149_v2 }
 0x2ed   : > { %v2489_v45 = vmul.f32 %v766_v22, %v2143_v0 }
 0x2ee   : > { %3076 = vst [vmem:[#allocation19_spill] sm:$0xff] %v2449_v44  ;;  %v787_v39 = vmax.f32 %v785_v25, %v2449_v44  ;;  %v800_v49 = vmax.f32 %v798_v26, %v2452_v24  ;;  %v2492_v25 = vmul.f32 %v766_v22, %v2146_v1 }
 0x2ef   : > { %3077 = vst [vmem:[#allocation20_spill] sm:$0xff] %v2452_v24 }
 0x2f0   : > { %3080 = vst [vmem:[#allocation23_spill] sm:$0xff] %v2469_v6  ;;  %v789_v2 = vmax.f32 %v787_v39, %v2489_v45 }
 0x2f1   : > { %v741_v27 = vpop.permute.xlu1 %740  ;;  %3082 = vst [vmem:[#allocation25_spill] sm:$0xff] %v2483_v12 }
 0x2f2   : > { %v2463_v30 = vmul.f32 %v741_v27, %v2191_v19  ;;  %v2466_v5 = vmul.f32 %v741_v27, %v2194_v20  ;;  %3084 = vst [vmem:[#allocation27_spill] sm:$0xff] %v2489_v45 }
 0x2f3   : > { %3085 = vst [vmem:[#allocation28_spill] sm:$0xff] %v2492_v25 }
 0x2f4   : > { %3078 = vst [vmem:[#allocation21_spill] sm:$0xff] %v2463_v30  ;;  %v784_v3 = vmax.f32 %v2437_v53, %v2463_v30  ;;  %v797_v19 = vmax.f32 %v2440_v41, %v2466_v5  ;;  %v811_v29 = vadd.f32 %v810_v14, %v2463_v30  ;;  %v824_v20 = vadd.f32 %v823_v15, %v2466_v5 }
 0x2f5   : > { %3079 = vst [vmem:[#allocation22_spill] sm:$0xff] %v2466_v5  ;;  %v802_v5 = vmax.f32 %v800_v49, %v2492_v25 }
 0x2f6   : > { %v786_v26 = vmax.f32 %v784_v3, %v2469_v6  ;;  %v799_v27 = vmax.f32 %v797_v19, %v2472_v11  ;;  %v812_v14 = vadd.f32 %v811_v29, %v2443_v37  ;;  %v825_v15 = vadd.f32 %v824_v20, %v2446_v43 }
 0x2f8   : > { %v788_v4 = vmax.f32 %v786_v26, %v2483_v12  ;;  %v801_v0 = vmax.f32 %v799_v27, %v2486_v13  ;;  %v813_v32 = vadd.f32 %v812_v14, %v2469_v6  ;;  %v826_v1 = vadd.f32 %v825_v15, %v2472_v11 }
 0x2fa   : > { %v790_v22 = vmax.f32 %v788_v4, %v789_v2  ;;  %v803_v3 = vmax.f32 %v801_v0, %v802_v5  ;;  %v814_v19 = vadd.f32 %v813_v32, %v2449_v44  ;;  %v827_v29 = vadd.f32 %v826_v1, %v2452_v24 }
 0x2fc   : > { %v791_v37 = vrot.slane %v790_v22, 4  ;;  %v804_v20 = vrot.slane %v803_v3, 4  ;;  %v815_v39 = vadd.f32 %v814_v19, %v2483_v12  ;;  %v828_v49 = vadd.f32 %v827_v29, %v2486_v13 }
 0x2fe   : > { %v792_v43 = vmax.f32 %v790_v22, %v791_v37  ;;  %v805_v26 = vmax.f32 %v803_v3, %v804_v20  ;;  %v816_v27 = vadd.f32 %v815_v39, %v2489_v45  ;;  %v829_v14 = vadd.f32 %v828_v49, %v2492_v25 }
 0x2ff   : > { %v1994_v3 = vmov 46  }
 0x300   : > { %v793_v6 = vrot.slane %v792_v43, 2  ;;  %v806_v15 = vrot.slane %v805_v26, 2  ;;  %v817_v2 = vrot.slane %v816_v27, 4  ;;  %v830_v5 = vrot.slane %v829_v14, 4  ;;  %1804 = vset.pattern.permute.xlu1 %v1994_v3 }
 0x302   : > { %v818_v4 = vadd.f32 %v817_v2, %v816_v27  ;;  %v831_v0 = vadd.f32 %v830_v5, %v829_v14  ;;  %v794_v32 = vmax.f32 %v792_v43, %v793_v6  ;;  %v807_v1 = vmax.f32 %v805_v26, %v806_v15  ;;  %v1313_v14 = vpop.permute.xlu0 %1312  ;;  %v2546_v26 = vpop.permute.xlu2 %1222 }
 0x303   : > { %v2550_v2 = vpop.permute.xlu1 %1296 }
 0x304   : > { %v819_v24 = vrot.slane %v818_v4, 2  ;;  %v832_v44 = vrot.slane %v831_v0, 2  ;;  %v795_v12 = vrot.slane %v794_v32, 1  ;;  %v808_v29 = vrot.slane %v807_v1, 1 }
 0x306   : > { %v820_v11 = vadd.f32 %v819_v24, %v818_v4  ;;  %v833_v19 = vadd.f32 %v832_v44, %v831_v0  ;;  %v796_v49 = vmax.f32 %v794_v32, %v795_v12  ;;  %v809_v25 = vmax.f32 %v807_v1, %v808_v29 }
 0x308   : > { %v821_v37 = vrot.slane %v820_v11, 1  ;;  %v834_v22 = vrot.slane %v833_v19, 1 }
 0x30a   : > { %v822_v20 = vadd.f32 %v821_v37, %v820_v11  ;;  %v835_v39 = vadd.f32 %v834_v22, %v833_v19  ;;  %v1997_v11 = vmov 40   ;;  %v2548_v15 = vpop.permute.xlu2 %1290  ;;  %v2568_v22 = vpop.permute.xlu0 %1262 }
 0x30b   : > { %1803 = vset.pattern.permute.xlu2 %v1997_v11  ;;  %v2554_v4 = vpop.permute.xlu1 %1364  ;;  %3093 = vst [vmem:[#allocation36_spill] sm:$0xff] %v2568_v22 }
 0x30c   : > { %v836_v45 = vmul.f32 0.015625, %v822_v20  ;;  %v837_v27 = vmul.f32 0.015625, %v835_v39 }
 0x30e   : > { %v2510_v43 = vsel %vm838_vm6, %v796_v49, %v836_v45  ;;  %v2512_v6 = vsel %vm838_vm6, %v809_v25, %v837_v27  ;;  %v2002_v25 = vmov 41  }
 0x30f   : > { %v2515_v44 = vmul.f32 %v1313_v14, %v2510_v43  ;;  %v2518_v24 = vmul.f32 %v1313_v14, %v2512_v6  ;;  %859 = vrot.lane.b32.xlu1 %v2512_v6, %s1995_s26  ;;  %842 = vrot.lane.b32.xlu0 %v2512_v6, %s1996_s27  ;;  %v2525_v12 = vmul.f32 %v2419_v38, %v2512_v6 }
 0x310   : > { %846 = vrot.lane.b32.xlu2 %v2510_v43, %s1996_s27  ;;  %v2529_v45 = vmul.f32 %v2419_v38, %v2510_v43  ;;  %v2001_v38 = vmov 47   ;;  %v2581_v13 = vmul.f32 %v2333_v63, %v2510_v43  ;;  %v2585_v30 = vmul.f32 %v2343_v17, %v2510_v43 }
 0x311   : > { %3086 = vst [vmem:[#allocation29_spill] sm:$0xff] %v2515_v44  ;;  %v2589_v41 = vmul.f32 %v2365_v23, %v2510_v43  ;;  %v2593_v61 = vmul.f32 %v2365_v23, %v2512_v6  ;;  %v2601_v51 = vmul.f32 %v2408_v46, %v2510_v43 }
 0x312   : > { %3087 = vst [vmem:[#allocation30_spill] sm:$0xff] %v2518_v24  ;;  %v2552_v5 = vpop.permute.xlu2 %1304 }
 0x313   : > { %3088 = vst [vmem:[#allocation31_spill] sm:$0xff] %v2525_v12  ;;  %v2558_v32 = vpop.permute.xlu1 %1246 }
 0x314   : > { %3089 = vst [vmem:[#allocation32_spill] sm:$0xff] %v2529_v45 }
 0x315   : > { %3090 = vst [vmem:[#allocation33_spill] sm:$0xff] %v2558_v32 }
 0x316   : > { %3095 = vst [vmem:[#allocation38_spill] sm:$0xff] %v2593_v61 }
 0x317   : > { %878 = vrot.lane.b32.xlu1 %v2510_v43, %s1998_s29  ;;  %862 = vrot.lane.b32.xlu0 %v2510_v43, %s1995_s26  ;;  %3097 = vst [vmem:[#allocation40_spill] sm:$0xff] %v2601_v51 }
 0x318   : > { %875 = vrot.lane.b32.xlu2 %v2512_v6, %s1998_s29 }
 0x31a   : > { %v2556_v0 = vpop.permute.xlu2 %1370 }
 0x31b   : > { %v2562_v19 = vpop.permute.xlu1 %1254 }
 0x31c   : > { %3091 = vst [vmem:[#allocation34_spill] sm:$0xff] %v2562_v19 }
 0x31f   : > { %906 = vrot.lane.b32.xlu1 %v2510_v43, %s1999_s9  ;;  %890 = vrot.lane.b32.xlu0 %v2510_v43, %s1967_s24 }
 0x320   : > { %892 = vrot.lane.b32.xlu2 %v2512_v6, %s1967_s24  ;;  %s2966_s24 = scalar_lea.vmem [#allocation6], %s1616_s13  ;;  %s1644_s13 = sshll.u32 %s2065_s4, 7 }
 0x321   : > { %s1532_s29 = scalar_lea.hbm %s3035_s5, %s1644_s13  ;;  %s1533_s4 = sshll.u32 %s2966_s24, 4  ;;  %s1534_s4 = int_to_ptr.vmem [resolvable:$true] %s1533_s4 }
 0x322   : > { %v2560_v1 = vpop.permute.xlu2 %1378 }
 0x323   : > { %v1387_v3 = vpop.permute.xlu1 %1386 }
 0x324   : > { %v2604_v35 = vmul.f32 %v1387_v3, %v2510_v43  ;;  %v2607_v23 = vmul.f32 %v1387_v3, %v2512_v6 }
 0x327   : > { %924 = vrot.lane.b32.xlu1 %v2512_v6, %s2000_s10  ;;  %908 = vrot.lane.b32.xlu0 %v2512_v6, %s1999_s9  ;;  %s1535_s9 = sshll.u32 %s1532_s29, 4  ;;  %s1536_s9 = int_to_ptr.hbm [resolvable:$true] %s1535_s9 }
 0x328   : > { %922 = vrot.lane.b32.xlu2 %v2510_v43, %s2000_s10  ;;  %s1521_s10 = scalar_lea.sflag [#allocation5], %s2130_s12 }
 0x32a   : > { %v2564_v29 = vpop.permute.xlu2 %1320 }
 0x32f   : > { %1394 = vperm.xlu1 %1804, %v2236_v7  }
 0x330   : > { %1328 = vperm.xlu2 %1803, %v2236_v7  }
 0x337   : > { %1806 = vset.pattern.permute.xlu1 %v2001_v38 }
 0x338   : > { %1402 = vperm.xlu1 %1806, %v2236_v7   ;;  %1805 = vset.pattern.permute.xlu2 %v2002_v25 }
 0x339   : > { %1336 = vperm.xlu2 %1805, %v2236_v7   ;;  %v246_v7 = vlaneseq }
 0x33b   : > { %v2566_v37 = vand.u32 127, %v246_v7  ;;  %v2577_v7 = vmul.f32 %v2343_v17, %v2512_v6  ;;  %v2597_v17 = vmul.f32 %v2333_v63, %v2512_v6 }
 0x33d   : > { %3092 = vst [vmem:[#allocation35_spill] sm:$0xff] %v2566_v37  ;;  %v2571_v20 = vadd.s32 128, %v2566_v37  ;;  %v249_v49 = vand.u32 15, %v2566_v37 }
 0x33e   : > { %3096 = vst [vmem:[#allocation39_spill] sm:$0xff] %v2597_v17 }
 0x33f   : > { %3094 = vst [vmem:[#allocation37_spill] sm:$0xff] %v2571_v20  ;;  %v250_v27 = vand.u32 15, %v2571_v20  ;;  %v253_v14 = vadd.s32 4294967293, %v249_v49  ;;  %v269_v9 = vadd.s32 4294967295, %v249_v49  ;;  %v261_v37 = vadd.s32 4294967294, %v249_v49 }
 0x340   : > { %v2609_v45 = vadd.s32 1, %v249_v49  ;;  %v2618_v3 = vadd.s32 3, %v249_v49  ;;  %v2622_v22 = vadd.s32 2, %v249_v49 }
 0x341   : > { %v254_v38 = vadd.s32 4294967293, %v250_v27  ;;  %vm255_vm8 = vcmp.ge.s32.totalorder %v253_v14, 0  ;;  %v270_v20 = vadd.s32 4294967295, %v250_v27  ;;  %v262_v44 = vadd.s32 4294967294, %v250_v27 }
 0x342   : > { %vm271_vm10 = vcmp.ge.s32.totalorder %v269_v9, 0  ;;  %v2616_v63 = vadd.s32 1, %v250_v27  ;;  %vm263_vm13 = vcmp.ge.s32.totalorder %v261_v37, 0  ;;  %v2620_v12 = vadd.s32 3, %v250_v27 }
 0x343   : > { %vm256_vm9 = vcmp.ge.s32.totalorder %v254_v38, 0  ;;  %v2613_v38 = vmul.f32 %v2408_v46, %v2512_v6  ;;  %vm272_vm12 = vcmp.ge.s32.totalorder %v270_v20, 0  ;;  %vm264_vm14 = vcmp.ge.s32.totalorder %v262_v44, 0 }
 0x344   : > { %vm281_vm1 = vcmp.lt.s32.totalorder %v2609_v45, 16  ;;  %vm282_vm2 = vcmp.lt.s32.totalorder %v2616_v63, 16  ;;  %vm289_vm4 = vcmp.lt.s32.totalorder %v2622_v22, 16  ;;  %vm298_vm6 = vcmp.lt.s32.totalorder %v2620_v12, 16 }
 0x345   : > { %3098 = vst [vmem:[#allocation41_spill] sm:$0xff] %v2613_v38 }
 0x36a   : > { %v847_v39 = vpop.permute.xlu2 %846 }
 0x372   : > { %v876_v53 = vpop.permute.xlu2 %875 }
 0x381   : > { %v860_v11 = vpop.permute.xlu1 %859  ;;  %v843_v25 = vpop.permute.xlu0 %842 }
 0x382   : > { %v852_v36 = vsel %vm848_vm7, %v843_v25, %v847_v39  ;;  %v849_v24 = vsel %vm848_vm7, %v847_v39, %v843_v25  ;;  %vm297_vm7 = vcmp.lt.s32.totalorder %v2618_v3, 16 }
 0x383   : > { %v857_v39 = vsel %vm255_vm8, %v852_v36, 0.0  ;;  %v858_v25 = vsel %vm256_vm9, %v849_v24, 0.0  ;;  %v2628_v24 = vadd.s32 2, %v250_v27 }
 0x384   : > { %v2625_v46 = vmul.f32 %v2425_v47, %v857_v39  ;;  %v944_v44 = vmul.f32 %v2425_v47, %v858_v25  ;;  %v1015_v49 = vmul.f32 %v2328_v60, %v857_v39  ;;  %v2635_v19 = vmul.f32 %v2328_v60, %v858_v25 }
 0x385   : > { %v2638_v17 = vmul.f32 %v2353_v33, %v857_v39  ;;  %v2642_v27 = vmul.f32 %v2353_v33, %v858_v25  ;;  %v1163_v47 = vmul.f32 %v2402_v34, %v857_v39  ;;  %v2650_v32 = vmul.f32 %v2413_v50, %v858_v25 }
 0x386   : > { %v2658_v33 = vmul.f32 %v2548_v15, %v857_v39  ;;  %vm290_vm5 = vcmp.lt.s32.totalorder %v2628_v24, 16 }
 0x387   : > { %3100 = vst [vmem:[#allocation43_spill] sm:$0xff] %v2650_v32 }
 0x389   : > { %v879_v43 = vpop.permute.xlu1 %878  ;;  %v863_v51 = vpop.permute.xlu0 %862 }
 0x38a   : > { %v865_v36 = vsel %vm864_vm11, %v863_v51, %v860_v11  ;;  %v868_v6 = vsel %vm864_vm11, %v860_v11, %v863_v51  ;;  %v883_v37 = vsel %vm432_vm0, %v876_v53, %v879_v43  ;;  %v880_v51 = vsel %vm432_vm0, %v879_v43, %v876_v53 }
 0x38b   : > { %v873_v14 = vsel %vm263_vm13, %v868_v6, 0.0  ;;  %v874_v38 = vsel %vm264_vm14, %v865_v36, 0.0  ;;  %v1164_v11 = vmul.f32 %v2402_v34, %v858_v25  ;;  %v2647_v36 = vmul.f32 %v2413_v50, %v857_v39  ;;  %v893_v6 = vpop.permute.xlu2 %892 }
 0x38c   : > { %v2653_v60 = vsel %vm271_vm10, %v883_v37, 0.0  ;;  %v1169_v42 = vmul.f32 %v2404_v28, %v873_v14  ;;  %v1170_v53 = vmul.f32 %v2404_v28, %v874_v38  ;;  %v2661_v43 = vsel %vm272_vm12, %v880_v51, 0.0 }
 0x38d   : > { %3099 = vst [vmem:[#allocation42_spill] sm:$0xff] %v2647_v36  ;;  %vm926_vm0 = vcmask 1022976   ;;  %v1367_v34 = vmul.f32 %v2554_v4, %v857_v39  ;;  %v1368_v50 = vmul.f32 %v2554_v4, %v858_v25  ;;  %v1373_v28 = vmul.f32 %v2556_v0, %v873_v14 }
 0x38e   : > { %v2665_v36 = vadd.f32 %v1169_v42, %v1163_v47  ;;  %v2667_v9 = vadd.f32 %v1170_v53, %v1164_v11  ;;  %v1374_v20 = vmul.f32 %v2556_v0, %v874_v38  ;;  %v1294_v37 = vmul.f32 %v2548_v15, %v858_v25 }
 0x38f   : > { %v950_v51 = vmul.f32 %v2317_v54, %v874_v38  ;;  %v1021_v39 = vmul.f32 %v2331_v62, %v873_v14  ;;  %v1381_v42 = vmul.f32 %v2560_v1, %v2653_v60  ;;  %v1375_v11 = vadd.f32 %v1373_v28, %v1367_v34 }
 0x390   : > { %3101 = vst [vmem:[#allocation44_spill] sm:$0xff] %v2665_v36  ;;  %v1376_v53 = vadd.f32 %v1374_v20, %v1368_v50  ;;  %v1382_v15 = vmul.f32 %v2560_v1, %v2661_v43  ;;  %v2685_v0 = vmul.f32 %v2406_v18, %v2653_v60  ;;  %v2689_v25 = vmul.f32 %v2406_v18, %v2661_v43 }
 0x391   : > { %3102 = vst [vmem:[#allocation45_spill] sm:$0xff] %v2667_v9  ;;  %v907_v32 = vpop.permute.xlu1 %906  ;;  %v891_v4 = vpop.permute.xlu0 %890  ;;  %v949_v9 = vmul.f32 %v2317_v54, %v873_v14  ;;  %v2694_v61 = vmul.f32 %v2331_v62, %v874_v38  ;;  %v1095_v34 = vmul.f32 %v2357_v40, %v873_v14  ;;  %v1383_v50 = vadd.f32 %v1381_v42, %v1375_v11 }
 0x392   : > { %v895_v47 = vsel %vm894_vm15, %v891_v4, %v893_v6  ;;  %3103 = vst [vmem:[#allocation46_spill] sm:$0xff] %v2685_v0  ;;  %v899_v36 = vsel %vm894_vm15, %v893_v6, %v891_v4  ;;  %v1384_v28 = vadd.f32 %v1382_v15, %v1376_v53  ;;  %v1300_v1 = vmul.f32 %v2550_v2, %v874_v38 }
 0x393   : > { %v2700_v20 = vsel %vm281_vm1, %v895_v47, 0.0  ;;  %v952_v0 = vadd.f32 %v950_v51, %v944_v44  ;;  %v958_v18 = vmul.f32 %v2322_v57, %v2661_v43  ;;  %v2706_v54 = vsel %vm282_vm2, %v899_v36, 0.0  ;;  %v923_v51 = vpop.permute.xlu2 %922 }
 0x394   : > { %v1391_v62 = vadd.f32 %v2604_v35, %v1383_v50  ;;  %v1392_v6 = vadd.f32 %v2607_v23, %v1384_v28  ;;  %v1023_v4 = vadd.f32 %v1021_v39, %v1015_v49  ;;  %v1096_v42 = vmul.f32 %v2357_v40, %v874_v38 }
 0x395   : > { %v2712_v11 = vmul.f32 %v2546_v26, %v873_v14  ;;  %v960_v45 = vadd.f32 %v958_v18, %v952_v0  ;;  %v1029_v44 = vmul.f32 %v2350_v31, %v2653_v60  ;;  %v2717_v47 = vmul.f32 %v2546_v26, %v874_v38 }
 0x396   : > { %v1299_v63 = vmul.f32 %v2550_v2, %v873_v14  ;;  %v2722_v35 = vmul.f32 %v2552_v5, %v2653_v60  ;;  %v1308_v40 = vmul.f32 %v2552_v5, %v2661_v43  ;;  %v1302_v36 = vadd.f32 %v1300_v1, %v1294_v37 }
 0x397   : > { %v974_v39 = vmul.f32 %v2320_v56, %v2706_v54  ;;  %v1031_v53 = vadd.f32 %v1029_v44, %v1023_v4  ;;  %v1045_v26 = vmul.f32 %v2336_v8, %v2700_v20  ;;  %v968_v0 = vadd.f32 %v2577_v7, %v960_v45 }
 0x398   : > { %v951_v50 = vadd.f32 %v949_v9, %v2625_v46  ;;  %v2749_v1 = vadd.f32 %v1299_v63, %v2658_v33  ;;  %v1097_v22 = vadd.f32 %v1095_v34, %v2638_v17  ;;  %v2761_v46 = vadd.f32 %v1308_v40, %v1302_v36 }
 0x399   : > { %v925_v23 = vpop.permute.xlu1 %924  ;;  %v909_v49 = vpop.permute.xlu0 %908  ;;  %v976_v18 = vadd.f32 %v974_v39, %v968_v0  ;;  %v1039_v12 = vadd.f32 %v2581_v13, %v1031_v53  ;;  %v1103_v17 = vmul.f32 %v2394_v55, %v2653_v60  ;;  %v2773_v13 = vmul.f32 %v2564_v29, %v2706_v54 }
 0x39a   : > { %v927_v38 = vsel %vm926_vm0, %v923_v51, %v925_v23  ;;  %v931_v2 = vsel %vm926_vm0, %v925_v23, %v923_v51  ;;  %v911_v14 = vsel %vm910_vm3, %v907_v32, %v909_v49  ;;  %v915_v15 = vsel %vm910_vm3, %v909_v49, %v907_v32 }
 0x39b   : > { %v2736_v5 = vsel %vm289_vm4, %v911_v14, 0.0  ;;  %v2740_v37 = vsel %vm290_vm5, %v915_v15, 0.0  ;;  %v2746_v28 = vsel %vm298_vm6, %v931_v2, 0.0  ;;  %v957_v32 = vmul.f32 %v2322_v57, %v2653_v60 }
 0x39c   : > { %v2756_v24 = vsel %vm297_vm7, %v927_v38, 0.0  ;;  %v982_v7 = vmul.f32 %v2326_v59, %v2740_v37  ;;  %v1053_v33 = vmul.f32 %v2339_v16, %v2736_v5  ;;  %v973_v57 = vmul.f32 %v2320_v56, %v2700_v20 }
 0x39d   : > { %v990_v9 = vmul.f32 %v2324_v58, %v2746_v28  ;;  %v1047_v34 = vadd.f32 %v1045_v26, %v1039_v12  ;;  %v959_v4 = vadd.f32 %v957_v32, %v951_v50  ;;  %v1061_v45 = vmul.f32 %v2345_v21, %v2756_v24  ;;  %v3104_v12 = vld [vmem:[#allocation38_spill] sm:$0xff] }
 0x39e   : > { %v984_v3 = vadd.f32 %v982_v7, %v976_v18  ;;  %v981_v44 = vmul.f32 %v2326_v59, %v2736_v5  ;;  %v1105_v56 = vadd.f32 %v1103_v17, %v1097_v22  ;;  %v1119_v49 = vmul.f32 %v2397_v52, %v2700_v20  ;;  %v3106_v17 = vld [vmem:[#allocation12_spill] sm:$0xff] }
 0x39f   : > { %v1055_v40 = vadd.f32 %v1053_v33, %v1047_v34  ;;  %v967_v23 = vadd.f32 %v2585_v30, %v959_v4  ;;  %v1127_v26 = vmul.f32 %v2399_v48, %v2736_v5  ;;  %v989_v2 = vmul.f32 %v2324_v58, %v2756_v24 }
 0x3a0   : > { %v992_v63 = vadd.f32 %v990_v9, %v984_v3  ;;  %v1113_v53 = vadd.f32 %v2589_v41, %v1105_v56  ;;  %v1098_v30 = vadd.f32 %v1096_v42, %v2642_v27  ;;  %v1104_v50 = vmul.f32 %v2394_v55, %v2661_v43  ;;  %v3107_v3 = vld [vmem:[#allocation33_spill] sm:$0xff]  ;;  %v3110_v56 = vld [vmem:[#allocation42_spill] sm:$0xff] }
 0x3a1   : > { %v1395_v51 = vpop.permute.xlu1 %1394  ;;  %v1063_v59 = vadd.f32 %v1061_v45, %v1055_v40  ;;  %v975_v38 = vadd.f32 %v973_v57, %v967_v23  ;;  %v1135_v32 = vmul.f32 %v2363_v10, %v2756_v24  ;;  %v1120_v22 = vmul.f32 %v2397_v52, %v2706_v54  ;;  %v1329_v23 = vpop.permute.xlu2 %1328 }
 0x3a2   : > { %v1397_v36 = vmul.f32 %v1395_v51, %v2700_v20  ;;  %v1398_v39 = vmul.f32 %v1395_v51, %v2706_v54  ;;  %994 = vrot.lane.b32.xlu1 %v992_v63, %s2003_s8  ;;  %v1121_v0 = vadd.f32 %v1119_v49, %v1113_v53  ;;  %v1128_v58 = vmul.f32 %v2399_v48, %v2740_v37 }
 0x3a3   : > { %1070 = vrot.lane.b32.xlu2 %v1063_v59, %s2004_s11  ;;  %v983_v41 = vadd.f32 %v981_v44, %v975_v38  ;;  %v1030_v55 = vmul.f32 %v2350_v31, %v2661_v43  ;;  %v1136_v18 = vmul.f32 %v2363_v10, %v2746_v28  ;;  %v1046_v7 = vmul.f32 %v2336_v8, %v2706_v54  ;;  %v3109_v44 = vld [vmem:[#allocation34_spill] sm:$0xff]  ;;  %v3112_v38 = vld [vmem:[#allocation31_spill] sm:$0xff] }
 0x3a4   : > { %v1399_v14 = vadd.f32 %v1397_v36, %v1391_v62  ;;  %v1400_v15 = vadd.f32 %v1398_v39, %v1392_v6  ;;  %v1129_v27 = vadd.f32 %v1127_v26, %v1121_v0  ;;  %v1106_v62 = vadd.f32 %v1104_v50, %v1098_v30  ;;  %v3111_v39 = vld [vmem:[#allocation36_spill] sm:$0xff] }
 0x3a5   : > { %v1024_v6 = vadd.f32 %v2694_v61, %v2635_v19  ;;  %v991_v42 = vadd.f32 %v989_v2, %v983_v41  ;;  %v1054_v52 = vmul.f32 %v2339_v16, %v2740_v37  ;;  %v1062_v57 = vmul.f32 %v2345_v21, %v2746_v28  ;;  %v3105_v19 = vld [vmem:[#allocation43_spill] sm:$0xff]  ;;  %v3113_v41 = vld [vmem:[#allocation44_spill] sm:$0xff] }
 0x3a6   : > { %v1114_v48 = vadd.f32 %v3104_v12, %v1106_v62  ;;  %v1137_v61 = vadd.f32 %v1135_v32, %v1129_v27  ;;  %v1228_v31 = vadd.f32 %v2717_v47, %v3105_v19  ;;  %v1234_v10 = vmul.f32 %v3106_v17, %v2661_v43  ;;  %v3108_v16 = vld [vmem:[#allocation39_spill] sm:$0xff]  ;;  %v3114_v32 = vld [vmem:[#allocation46_spill] sm:$0xff]  ;;  %v3115_v27 = vld [vmem:[#allocation32_spill] sm:$0xff] }
 0x3a7   : > { %v1032_v33 = vadd.f32 %v1030_v55, %v1024_v6  ;;  %998 = vrot.lane.b32.xlu0 %v991_v42, %s2003_s8  ;;  %v1250_v8 = vmul.f32 %v3107_v3, %v2706_v54  ;;  %v2005_v45 = vmov 48   ;;  %v1258_v21 = vmul.f32 %v3109_v44, %v2740_v37  ;;  %v3116_v6 = vld [vmem:[#allocation45_spill] sm:$0xff]  ;;  %v3119_v12 = vld [vmem:[#allocation10_spill] sm:$0xff]  ;;  %s1893_s8 = sshra.s32 %s1536_s9, 4  ;;  %s1894_s8 = int_to_ptr.hbm [resolvable:$true] %s1893_s8 }
 0x3a8   : > { %v1122_v34 = vadd.f32 %v1120_v22, %v1114_v48  ;;  %1807 = vset.pattern.permute.xlu0 %v2005_v45  ;;  %v1227_v51 = vadd.f32 %v2712_v11, %v3110_v56  ;;  %v1236_v43 = vadd.f32 %v1234_v10, %v1228_v31  ;;  %v1233_v40 = vmul.f32 %v3106_v17, %v2653_v60  ;;  %v3120_v19 = vld [vmem:[#allocation41_spill] sm:$0xff]  ;;  %p1900_p0 = scmp.lt.s32.totalorder %s1894_s8, %s3035_s5 }
 0x3a9   : > { %v1040_v4 = vadd.f32 %v3108_v16, %v1032_v33  ;;  %v1266_v53 = vmul.f32 %v3111_v39, %v2746_v28  ;;  %v1249_v11 = vmul.f32 %v3107_v3, %v2700_v20  ;;  %v1257_v60 = vmul.f32 %v3109_v44, %v2736_v5  ;;  %v3122_v44 = vld [vmem:[#allocation29_spill] sm:$0xff] }
 0x3aa   : > { %v1403_v9 = vpop.permute.xlu1 %1402  ;;  %1144 = vrot.lane.b32.xlu1 %v1137_v61, %s2006_s15  ;;  %v1130_v49 = vadd.f32 %v1128_v58, %v1122_v34  ;;  %v1244_v2 = vadd.f32 %v3112_v38, %v1236_v43  ;;  %v1235_v30 = vadd.f32 %v1233_v40, %v1227_v51  ;;  %v1179_v22 = vadd.f32 %v3114_v32, %v3113_v41 }
 0x3ab   : > { %v1405_v47 = vmul.f32 %v1403_v9, %v2736_v5  ;;  %v1406_v63 = vmul.f32 %v1403_v9, %v2740_v37  ;;  %v1048_v36 = vadd.f32 %v1046_v7, %v1040_v4  ;;  %v1201_v48 = vmul.f32 %v3119_v12, %v2736_v5 }
 0x3ac   : > { %v1138_v0 = vadd.f32 %v1136_v18, %v1130_v49  ;;  %v1252_v58 = vadd.f32 %v1250_v8, %v1244_v2  ;;  %v1243_v62 = vadd.f32 %v3115_v27, %v1235_v30  ;;  %v3118_v18 = vld [vmem:[#allocation40_spill] sm:$0xff]  ;;  %v1309_v17 = vadd.f32 %v2722_v35, %v2749_v1  ;;  %v3124_v49 = vld [vmem:[#allocation37_spill] sm:$0xff] }
 0x3ad   : > { %v2832_v26 = vadd.f32 %v1405_v47, %v1399_v14  ;;  %v2834_v59 = vadd.f32 %v1406_v63, %v1400_v15  ;;  %v1056_v50 = vadd.f32 %v1054_v52, %v1048_v36  ;;  %v1180_v14 = vadd.f32 %v2689_v25, %v3116_v6  ;;  %v3117_v15 = vld [vmem:[#allocation9_spill] sm:$0xff] }
 0x3ae   : > { %v1193_v55 = vmul.f32 %v3117_v15, %v2700_v20  ;;  %1140 = vrot.lane.b32.xlu2 %v1138_v0, %s2006_s15  ;;  %v1187_v7 = vadd.f32 %v3118_v18, %v1179_v22  ;;  %v1194_v52 = vmul.f32 %v3117_v15, %v2706_v54  ;;  %v1260_v33 = vadd.f32 %v1258_v21, %v1252_v58 }
 0x3af   : > { %v1064_v42 = vadd.f32 %v1062_v57, %v1056_v50  ;;  %v1251_v61 = vadd.f32 %v1249_v11, %v1243_v62  ;;  %v1188_v31 = vadd.f32 %v3120_v19, %v1180_v14  ;;  %v1202_v25 = vmul.f32 %v3119_v12, %v2740_v37  ;;  %v3121_v57 = vld [vmem:[#allocation30_spill] sm:$0xff] }
 0x3b0   : > { %v1318_v10 = vadd.f32 %v3121_v57, %v2761_v46  ;;  %v1195_v3 = vadd.f32 %v1193_v55, %v1187_v7  ;;  %v1332_v54 = vmul.f32 %v1329_v23, %v2740_v37  ;;  %v1268_v8 = vadd.f32 %v1266_v53, %v1260_v33  ;;  %v1337_v46 = vpop.permute.xlu2 %1336 }
 0x3b1   : > { %1066 = vrot.lane.b32.xlu0 %v1064_v42, %s2004_s11  ;;  %v1259_v9 = vadd.f32 %v1257_v60, %v1251_v61  ;;  %v1196_v34 = vadd.f32 %v1194_v52, %v1188_v31  ;;  %v1323_v16 = vmul.f32 %v2564_v29, %v2700_v20  ;;  %v1265_v4 = vmul.f32 %v3111_v39, %v2756_v24  ;;  %s1895_s11 = scalar_lea.hbm %s1894_s8, 128 }
 0x3b2   : > { %v2865_v45 = vadd.f32 %v1201_v48, %v1195_v3  ;;  %v1326_v35 = vadd.f32 %v2773_v13, %v1318_v10  ;;  %1273 = vrot.lane.b32.xlu1 %v1268_v8, %s2007_s19  ;;  %v1317_v37 = vadd.f32 %v3122_v44, %v1309_v17  ;;  %v1331_v21 = vmul.f32 %v1329_v23, %v2736_v5  ;;  %v1848_v13 = vld [vmem:[%s3033_s3] sm:$0x3]  ;;  %v3123_v5 = vld [vmem:[#allocation35_spill] sm:$0xff]  ;;  %p1896_p6 = scmp.ne.s32.totalorder %s1894_s8, %s1895_s11  ;;  %p1901_p1 = scmp.lt.s32.totalorder %s1899_s14, %s1895_s11 }
 0x3b3   : > { %v2868_v1 = vadd.f32 %v1202_v25, %v1196_v34  ;;  %v1267_v56 = vadd.f32 %v1265_v4, %v1259_v9  ;;  %v1340_v29 = vmul.f32 %v1337_v46, %v2746_v28  ;;  %v1339_v43 = vmul.f32 %v1337_v46, %v2756_v24  ;;  %v3136_v25 = vld [vmem:[#allocation11_spill] sm:$0xff] }
 0x3b4   : > { %v1334_v51 = vadd.f32 %v1332_v54, %v1326_v35  ;;  %v1325_v47 = vadd.f32 %v1323_v16, %v1317_v37  ;;  %v2878_v23 = vshra.s32 %v3123_v5, 4  ;;  %v2881_v36 = vshra.s32 %v3124_v49, 4  ;;  %v3150_v5 = vld [vmem:[#allocation22_spill] sm:$0xff]  ;;  %p1897_p9 = pnand %p1896_p6, %p2094_p11  ;;  %p1902_p3 = por %p1901_p1, %p1900_p0 }
 0x3b5   : > { %v3125_v41 = vmov 0  ;;  %vm1000_vm15 = vcmask 392192   ;;  %vm1146_vm7 = vcmask 130048   ;;  %v1209_v17 = vmul.f32 %v3136_v25, %v2756_v24 }
 0x3b6   : > { %1271 = vrot.lane.b32.xlu2 %v1267_v56, %s2007_s19  ;;  %v1333_v20 = vadd.f32 %v1331_v21, %v1325_v47  ;;  %v1342_v63 = vadd.f32 %v1340_v29, %v1334_v51  ;;  %v301_v53 = vadd.s32 4294967293, %v2878_v23  ;;  %v302_v38 = vadd.s32 4294967293, %v2881_v36  ;;  %p1898_p13 = pneg %p1897_p9 }
 0x3b7   : > { %v309_v30 = vadd.s32 4294967294, %v2878_v23  ;;  %v310_v0 = vadd.s32 4294967294, %v2881_v36  ;;  %v317_v50 = vadd.s32 4294967295, %v2878_v23  ;;  %v318_v60 = vadd.s32 4294967295, %v2881_v36 }
 0x3b8   : > { %v1341_v40 = vadd.f32 %v1339_v43, %v1333_v20  ;;  %vm303_vm8 = vcmp.ge.s32.totalorder %v301_v53, 0  ;;  %vm305_vm9 = vcmp.lt.s32.totalorder %v301_v53, 16  ;;  %vm304_vm10 = vcmp.ge.s32.totalorder %v302_v38, 0  ;;  %p1903_p4 = pnand %p1902_p3, %p1898_p13 }
 0x3b9   : > { %1410 = vperm.xlu0 %1807, %v1848_v13   ;;  %vm306_vm11 = vcmp.lt.s32.totalorder %v302_v38, 16  ;;  %vm311_vm12 = vcmp.ge.s32.totalorder %v309_v30, 0  ;;  %vm313_vm13 = vcmp.lt.s32.totalorder %v309_v30, 16  ;;  %vm2889_vm14 = vmand %vm303_vm8, %vm305_vm9  ;;  %vm312_vm1 = vcmp.ge.s32.totalorder %v310_v0, 0  ;;  %v3148_v13 = vld [vmem:[#allocation14_spill] sm:$0xff] }
 0x3ba   : > { %1347 = vrot.lane.b32.xlu1 %v1342_v63, %s2008_s16  ;;  %v3126_v41 = vsel %vm2889_vm14, 4294967295, %v3125_v41  ;;  %vm314_vm2 = vcmp.lt.s32.totalorder %v310_v0, 16  ;;  %vm2893_vm0 = vmand %vm304_vm10, %vm306_vm11  ;;  %vm319_vm3 = vcmp.ge.s32.totalorder %v317_v50, 0  ;;  %vm321_vm4 = vcmp.lt.s32.totalorder %v317_v50, 16 }
 0x3bb   : > { %vm320_vm5 = vcmp.ge.s32.totalorder %v318_v60, 0  ;;  %vm322_vm6 = vcmp.lt.s32.totalorder %v318_v60, 16  ;;  %vm2897_vm8 = vmand %vm311_vm12, %vm313_vm13  ;;  %vm1072_vm9 = vcmask 261120   ;;  %vm3135_vm12 = vnez %v3126_v41 }
 0x3bc   : > { %vm316_vm14 = vmand %vm312_vm1, %vm314_vm2  ;;  %v1210_v57 = vmul.f32 %v3136_v25, %v2746_v28  ;;  %v1211_v9 = vadd.f32 %v1209_v17, %v2865_v45  ;;  %v325_v45 = vadd.s32 1, %v2878_v23  ;;  %v333_v47 = vadd.s32 2, %v2878_v23 }
 0x3bd   : > { %vm2901_vm10 = vmand %vm319_vm3, %vm321_vm4  ;;  %v334_v29 = vadd.s32 2, %v2881_v36  ;;  %vm1275_vm2 = vcmask 916480   ;;  %v342_v20 = vadd.s32 3, %v2881_v36 }
 0x3be   : > { %1345 = vrot.lane.b32.xlu2 %v1341_v40, %s2008_s16  ;;  %vm2905_vm11 = vmand %vm320_vm5, %vm322_vm6  ;;  %v1212_v34 = vadd.f32 %v1210_v57, %v2868_v1  ;;  %v326_v1 = vadd.s32 1, %v2881_v36  ;;  %vm327_vm13 = vcmp.ge.s32.totalorder %v325_v45, 0  ;;  %vm337_vm3 = vcmp.lt.s32.totalorder %v333_v47, 16 }
 0x3bf   : > { %vm336_vm5 = vcmp.ge.s32.totalorder %v334_v29, 0  ;;  %vm338_vm6 = vcmp.lt.s32.totalorder %v334_v29, 16  ;;  %v3145_v29 = vld [vmem:[#allocation15_spill] sm:$0xff] }
 0x3c0   : > { %vm330_vm1 = vcmp.lt.s32.totalorder %v326_v1, 16 }
 0x3fd   : > { %v1071_v11 = vpop.permute.xlu2 %1070 }
 0x408   : > { %v1141_v6 = vpop.permute.xlu2 %1140 }
 0x410   : > { %v1272_v56 = vpop.permute.xlu2 %1271 }
 0x414   : > { %v995_v39 = vpop.permute.xlu1 %994 }
 0x419   : > { %v999_v2 = vpop.permute.xlu0 %998 }
 0x41a   : > { %v1001_v27 = vsel %vm1000_vm15, %v999_v2, %v995_v39  ;;  %v1004_v62 = vsel %vm1000_vm15, %v995_v39, %v999_v2  ;;  %vm328_vm15 = vcmp.ge.s32.totalorder %v326_v1, 0 }
 0x41b   : > { %v1009_v12 = vsel %vm3135_vm12, %v1004_v62, 0.0  ;;  %v1010_v48 = vsel %vm2893_vm0, %v1001_v27, 0.0  ;;  %vm335_vm0 = vcmp.ge.s32.totalorder %v333_v47, 0 }
 0x41c   : > { %v1145_v22 = vpop.permute.xlu1 %1144 }
 0x41d   : > { %v1147_v42 = vsel %vm1146_vm7, %v1145_v22, %v1141_v6  ;;  %v1150_v18 = vsel %vm1146_vm7, %v1141_v6, %v1145_v22  ;;  %vm1349_vm7 = vcmask 785408  }
 0x41e   : > { %v1155_v10 = vsel %vm2901_vm10, %v1150_v18, 0.0  ;;  %v1156_v3 = vsel %vm2905_vm11, %v1147_v42, 0.0  ;;  %vm2947_vm10 = vmand %vm336_vm5, %vm338_vm6 }
 0x423   : > { %v1067_v15 = vpop.permute.xlu0 %1066 }
 0x424   : > { %v1073_v7 = vsel %vm1072_vm9, %v1071_v11, %v1067_v15  ;;  %v1076_v52 = vsel %vm1072_vm9, %v1067_v15, %v1071_v11  ;;  %v1274_v51 = vpop.permute.xlu1 %1273  ;;  %vm2943_vm9 = vmand %vm335_vm0, %vm337_vm3  ;;  %v1445_v15 = vstv %s359_s18 }
 0x425   : > { %v1081_v33 = vsel %vm2897_vm8, %v1076_v52, 0.0  ;;  %v1082_v61 = vsel %vm316_vm14, %v1073_v7, 0.0  ;;  %vm329_vm14 = vcmp.lt.s32.totalorder %v325_v45, 16  ;;  %vm2939_vm8 = vmand %vm328_vm15, %vm330_vm1  ;;  %v1276_v63 = vsel %vm1275_vm2, %v1272_v56, %v1274_v51 }
 0x426   : > { %v1083_v19 = vadd.f32 %v1081_v33, %v1009_v12  ;;  %v1084_v31 = vadd.f32 %v1082_v61, %v1010_v48  ;;  %vm2934_vm4 = vmand %vm327_vm13, %vm329_vm14  ;;  %v1280_v43 = vsel %vm1275_vm2, %v1274_v51, %v1272_v56  ;;  %vm344_vm13 = vcmp.ge.s32.totalorder %v342_v20, 0 }
 0x427   : > { %v1285_v36 = vsel %vm2934_vm4, %v1276_v63, 0.0  ;;  %v1286_v39 = vsel %vm2939_vm8, %v1280_v43, 0.0  ;;  %vm346_vm14 = vcmp.lt.s32.totalorder %v342_v20, 16  ;;  %vm1423_vm1 = vcmask 654336   ;;  %v3149_v43 = vld [vmem:[#allocation21_spill] sm:$0xff] }
 0x428   : > { %v1157_v54 = vadd.f32 %v1155_v10, %v1083_v19  ;;  %v1158_v8 = vadd.f32 %v1156_v3, %v1084_v31  ;;  %vm348_vm2 = vmand %vm344_vm13, %vm346_vm14 }
 0x42a   : > { %v1213_v16 = vadd.f32 %v1211_v9, %v1157_v54  ;;  %v1214_v4 = vadd.f32 %v1212_v34, %v1158_v8 }
 0x42b   : > { %v1411_v35 = vpop.permute.xlu0 %1410 }
 0x42c   : > { %v1413_v46 = vmul.f32 %v1411_v35, %v2756_v24  ;;  %v1414_v44 = vmul.f32 %v1411_v35, %v2746_v28  ;;  %v341_v28 = vadd.s32 3, %v2878_v23  ;;  %v1346_v24 = vpop.permute.xlu2 %1345  ;;  %v1287_v38 = vadd.f32 %v1285_v36, %v1213_v16 }
 0x42d   : > { %v1288_v2 = vadd.f32 %v1286_v39, %v1214_v4  ;;  %v3152_v39 = vld [vmem:[#allocation18_spill] sm:$0xff] }
 0x42e   : > { %v1415_v37 = vadd.f32 %v1413_v46, %v2832_v26  ;;  %v1416_v21 = vadd.f32 %v1414_v44, %v2834_v59  ;;  %v1348_v59 = vpop.permute.xlu1 %1347  ;;  %vm343_vm11 = vcmp.ge.s32.totalorder %v341_v28, 0  ;;  %vm345_vm12 = vcmp.lt.s32.totalorder %v341_v28, 16 }
 0x42f   : > { %v1350_v23 = vsel %vm1349_vm7, %v1346_v24, %v1348_v59  ;;  %v1354_v49 = vsel %vm1349_vm7, %v1348_v59, %v1346_v24  ;;  %vm347_vm15 = vmand %vm343_vm11, %vm345_vm12  ;;  %v3146_v24 = vld [vmem:[#allocation13_spill] sm:$0xff]  ;;  %v3147_v59 = vld [vmem:[#allocation16_spill] sm:$0xff] }
 0x430   : > { %1421 = vrot.lane.b32.xlu2 %v1416_v21, %s2009_s17  ;;  %1419 = vrot.lane.b32.xlu0 %v1415_v37, %s2009_s17  ;;  %v1359_v53 = vsel %vm2943_vm9, %v1350_v23, 0.0  ;;  %v1360_v11 = vsel %vm2947_vm10, %v1354_v49, 0.0  ;;  %v3151_v49 = vld [vmem:[#allocation17_spill] sm:$0xff] }
 0x431   : > { %v1361_v50 = vadd.f32 %v1359_v53, %v1287_v38  ;;  %v1362_v60 = vadd.f32 %v1360_v11, %v1288_v2  ;;  %v3153_v11 = vld [vmem:[#allocation23_spill] sm:$0xff]  ;;  %v3154_v2 = vld [vmem:[#allocation24_spill] sm:$0xff] }
 0x48a   : > { %v1422_v30 = vpop.permute.xlu2 %1421 }
 0x4a2   : > { %v1420_v0 = vpop.permute.xlu0 %1419 }
 0x4a3   : > { %v1424_v41 = vsel %vm1423_vm1, %v1420_v0, %v1422_v30  ;;  %v1428_v32 = vsel %vm1423_vm1, %v1422_v30, %v1420_v0  ;;  %v3155_v0 = vld [vmem:[#allocation19_spill] sm:$0xff] }
 0x4a4   : > { %v1433_v22 = vsel %vm347_vm15, %v1424_v41, 0.0  ;;  %v1434_v58 = vsel %vm348_vm2, %v1428_v32, 0.0  ;;  %v3157_v32 = vld [vmem:[#allocation25_spill] sm:$0xff] }
 0x4a5   : > { %v1435_v27 = vadd.f32 %v1433_v22, %v1361_v50  ;;  %v1436_v62 = vadd.f32 %v1434_v58, %v1362_v60  ;;  %v3156_v60 = vld [vmem:[#allocation20_spill] sm:$0xff]  ;;  %v3158_v58 = vld [vmem:[#allocation26_spill] sm:$0xff] }
 0x4a7   : > { %v1439_v6 = vrot.slane %v1435_v27, 1  ;;  %v1440_v14 = vrot.slane %v1436_v62, 1 }
 0x4a9   : > { %v1443_v55 = vadd.f32 %v1439_v6, %v1435_v27  ;;  %v1444_v42 = vadd.f32 %v1440_v14, %v1436_v62  ;;  %v3159_v62 = vld [vmem:[#allocation27_spill] sm:$0xff]  ;;  %v3160_v14 = vld [vmem:[#allocation28_spill] sm:$0xff] }
 0x4ab   : > { %v1446_v18 = vadd.f32 %v1445_v15, %v1443_v55  ;;  %v1447_v7 = vadd.f32 %v1445_v15, %v1444_v42 }
 0x4ad   : > { %v1636_v52 = vmul.f32 -1.442695, %v1446_v18  ;;  %v1637_v12 = vmul.f32 -1.442695, %v1447_v7 }
 0x4af   : > { %1840 = vpow2.f32 %v1636_v52 }
 0x4b0   : > { %1842 = vpow2.f32 %v1637_v12 }
 0x4b5   : > { %v1841_v48 = vpop.eup %1840 }
 0x4b6   : > { %v1843_v33 = vpop.eup %1842  ;;  %v1454_v61 = vadd.f32 1.0, %v1841_v48 }
 0x4b7   : > { %v1455_v19 = vadd.f32 1.0, %v1843_v33 }
 0x4b8   : > { %1844 = vrcp.f32 %v1454_v61  ;;  %v1467_v3 = vand.u32 2147483648, %v1454_v61  ;;  %v1465_v9 = vand.u32 2147483647, %v1454_v61  ;;  %vm1461_vm4 = vweird.f32 %v1454_v61 }
 0x4b9   : > { %1846 = vrcp.f32 %v1455_v19  ;;  %v1482_v34 = vand.u32 2147483648, %v1455_v19  ;;  %v1480_v4 = vand.u32 2147483647, %v1455_v19  ;;  %vm1476_vm6 = vweird.f32 %v1455_v19 }
 0x4ba   : > { %v1468_v46 = vor.u32 1.1754944e-38, %v1467_v3  ;;  %vm1466_vm7 = vcmp.eq.f32.partialorder %v1465_v9, 8.507059e+37 }
 0x4bb   : > { %v1483_v21 = vor.u32 1.1754944e-38, %v1482_v34  ;;  %vm1481_vm9 = vcmp.eq.f32.partialorder %v1480_v4, 8.507059e+37 }
 0x4be   : > { %v1845_v31 = vpop.eup %1844 }
 0x4bf   : > { %v1847_v25 = vpop.eup %1846  ;;  %v1457_v17 = vmul.f32 %v1845_v31, %v1454_v61  ;;  %vm1462_vm0 = vweird.f32 %v1845_v31 }
 0x4c0   : > { %v1472_v57 = vmul.f32 %v1847_v25, %v1455_v19  ;;  %vm1477_vm3 = vweird.f32 %v1847_v25  ;;  %vm1463_vm5 = vmor %vm1461_vm4, %vm1462_vm0 }
 0x4c1   : > { %v1458_v10 = vsub.f32 1.0, %v1457_v17  ;;  %vm1478_vm8 = vmor %vm1476_vm6, %vm1477_vm3 }
 0x4c2   : > { %v1473_v54 = vsub.f32 1.0, %v1472_v57 }
 0x4c3   : > { %v1459_v8 = vmul.f32 %v1845_v31, %v1458_v10 }
 0x4c4   : > { %v1474_v16 = vmul.f32 %v1847_v25, %v1473_v54 }
 0x4c5   : > { %v1460_v35 = vadd.f32 %v1845_v31, %v1459_v8 }
 0x4c6   : > { %v1475_v44 = vadd.f32 %v1847_v25, %v1474_v16 }
 0x4c7   : > { %v1464_v37 = vsel %vm1463_vm5, %v1845_v31, %v1460_v35 }
 0x4c8   : > { %v1469_v56 = vsel %vm1466_vm7, %v1468_v46, %v1464_v37  ;;  %v1479_v51 = vsel %vm1478_vm8, %v1847_v25, %v1475_v44 }
 0x4c9   : > { %v1484_v45 = vsel %vm1481_vm9, %v1483_v21, %v1479_v51  ;;  %v1486_v1 = vperm.slane %v1469_v56, 0 }
 0x4ca   : > { %v1487_v47 = vperm.slane %v1484_v45, 0 }
 0x4cb   : > { %v1488_v28 = vmul.f32 %v1486_v1, %v3145_v29  ;;  %v1490_v26 = vmul.f32 %v1486_v1, %v3146_v24  ;;  %v1492_v40 = vmul.f32 %v1486_v1, %v3149_v43  ;;  %v1494_v36 = vmul.f32 %v1486_v1, %v3151_v49 }
 0x4cc   : > { %v1489_v20 = vmul.f32 %v1487_v47, %v3147_v59  ;;  %v1491_v63 = vmul.f32 %v1487_v47, %v3148_v13  ;;  %v1493_v23 = vmul.f32 %v1487_v47, %v3150_v5  ;;  %v1495_v53 = vmul.f32 %v1487_v47, %v3152_v39 }
 0x4cd   : > { %1504 = vst [vmem:[%s2966_s24] sm:$0xff] %v1488_v28  ;;  %v1496_v38 = vmul.f32 %v1486_v1, %v3153_v11  ;;  %v1497_v30 = vmul.f32 %v1487_v47, %v3154_v2  ;;  %v1498_v50 = vmul.f32 %v1486_v1, %v3155_v0  ;;  %v1499_v41 = vmul.f32 %v1487_v47, %v3156_v60 }
 0x4ce   : > { %1505 = vst [vmem:[%s2966_s24 + $0x8] sm:$0xff] %v1489_v20  ;;  %v1500_v22 = vmul.f32 %v1486_v1, %v3157_v32  ;;  %v1501_v27 = vmul.f32 %v1487_v47, %v3158_v58  ;;  %v1502_v6 = vmul.f32 %v1486_v1, %v3159_v62  ;;  %v1503_v15 = vmul.f32 %v1487_v47, %v3160_v14 }
 0x4cf   : > { %1506 = vst [vmem:[%s2966_s24 + $0x10] sm:$0xff] %v1490_v26 }
 0x4d0   : > { %1507 = vst [vmem:[%s2966_s24 + $0x18] sm:$0xff] %v1491_v63 }
 0x4d1   : > { %1508 = vst [vmem:[%s2966_s24 + $0x20] sm:$0xff] %v1492_v40 }
 0x4d2   : > { %1509 = vst [vmem:[%s2966_s24 + $0x28] sm:$0xff] %v1493_v23 }
 0x4d3   : > { %1510 = vst [vmem:[%s2966_s24 + $0x30] sm:$0xff] %v1494_v36 }
 0x4d4   : > { %1511 = vst [vmem:[%s2966_s24 + $0x38] sm:$0xff] %v1495_v53 }
 0x4d5   : > { %1512 = vst [vmem:[%s2966_s24 + $0x40] sm:$0xff] %v1496_v38 }
 0x4d6   : > { %1513 = vst [vmem:[%s2966_s24 + $0x48] sm:$0xff] %v1497_v30 }
 0x4d7   : > { %1514 = vst [vmem:[%s2966_s24 + $0x50] sm:$0xff] %v1498_v50 }
 0x4d8   : > { %1515 = vst [vmem:[%s2966_s24 + $0x58] sm:$0xff] %v1499_v41 }
 0x4d9   : > { %1516 = vst [vmem:[%s2966_s24 + $0x60] sm:$0xff] %v1500_v22 }
 0x4da   : > { %1517 = vst [vmem:[%s2966_s24 + $0x68] sm:$0xff] %v1501_v27 }
 0x4db   : > { %1518 = vst [vmem:[%s2966_s24 + $0x70] sm:$0xff] %v1502_v6 }
 0x4dc   : > { %1519 = vst [vmem:[%s2966_s24 + $0x78] sm:$0xff] %v1503_v15 }
 0x4dd   : > { %1906 = shalt.err (!%p1903_p4)
}
 0x4de   : > { %s2010_s12 = smov 256  }
 0x4df   : > { %1649 = dma.vmem_to_hbm [thread:$0]  (%p2094_p11), %s1534_s4, 2048, %s1536_s9, %s1521_s10, %s2010_s12, %s2010_s12, %s2006_s15  }
 0x4e0 PF: > { %s1550_s18 = sand.u32 1, %s1933_s20   ;;  %p3161_p7 = scmp.ge.s32.totalorder %s1945_s23, 2 }
 0x4e1   : > { %s1551_s24 = scalar_lea.sflag [#allocation5], %s1550_s18 }
 0x4e2   : > { %p1656_p5 = pnand %p3161_p7, %p2098_p12 }
 0x4e4   : > { %p1657_p8 = pneg %p1656_p5 }
 0x4e6   : > { %1928 = dma.done.wait (%p1657_p8), %s1551_s24, 2048  }
 0x4e7   : > { %1930 = vsyncadd (%p1657_p8), %s1551_s24, 4294965248  ;;  %p19_p10 = scmp.ge.s32.totalorder %s2069_s25, 4   ;;  %s3162_s20 = smov %s1937_s21 }
 0x4e8   : > { %s3163_s21 = smov %s1941_s22  ;;  %s3164_s22 = smov %s2081_s28 }
 0x4e9   : > { %s3165_s23 = smov %s2069_s25  ;;  %21 = sbr.rel (!%p19_p10) target bundleno = 7 (0x7), region = 85 }
 0x4ee   :  { %1557 = vsyncpa [#allocation4], 1 }
 0x4ef   :  { %1559 = vsyncpa [#allocation4 + $0x1], 1 }
 0x4f0   :  { %1560 = vsyncpa [#allocation5], 1 }
 0x4f1   :  { %1562 = vsyncpa [#allocation5 + $0x1], 1 }

</bundles_post_ra>
